<compile_context>
chip_gen: v7x
topology: tpu7x:2x2x1
jax: 0.10.0
libtpu: 0.0.40
codegen_flags: <defaults>
</compile_context>

<pallas_src>
import numpy as np
import jax
import jax.numpy as jnp
from jax.experimental import pallas as pl
from jax.experimental.pallas import tpu as pltpu

ALPHA = 20.0


def _bilinear_weight_matrix(out_size: int, in_size: int) -> np.ndarray:
    """Per-axis interpolation matrix matching F.interpolate(mode='bilinear',
    align_corners=False): out = W @ in  (W shape (out_size, in_size))."""
    scale = in_size / out_size
    dst = np.arange(out_size, dtype=np.float64)
    src = np.maximum((dst + 0.5) * scale - 0.5, 0.0)
    i0 = np.minimum(np.floor(src).astype(np.int64), in_size - 1)
    i1 = np.minimum(i0 + 1, in_size - 1)
    frac = src - i0
    w = np.zeros((out_size, in_size), dtype=np.float64)
    w[np.arange(out_size), i0] += 1.0 - frac
    w[np.arange(out_size), i1] += frac
    return w


def _tensorcores_per_chip() -> int:
    """Best-effort detection of TensorCores per chip (2 on v7x, else 1)."""
    try:
        kind = jax.devices()[0].device_kind.lower()
    except Exception:
        return 1
    return 2 if ("v7" in kind or "7x" in kind) else 1


def _make_kernel(bseq: int, nmem: int, P: int):
    def kernel(temp_ref, tf_ref, trf_ref, w_ref, ut_ref, ts_ref, o_ref):
        temp = temp_ref[0, 0]
        uT = ut_ref[...]                              # (P, L), loaded once

        for b in range(bseq):                         # bseq is 1 or 2 (per-TC block)
            te = tf_ref[b]                            # (c, P)        channels on sublanes
            tr = trf_ref[b]                           # (c, nmem*P)   lane-dense train points

            # L2-normalize over channels: cheap sublane reduces on dense tiles.
            # Softmax temperature folded into the small test-side scale.
            # NOTE: no epsilon, matching the PyTorch reference (zero vectors -> NaN).
            tnn = te * (temp * jax.lax.rsqrt(jnp.sum(te * te, axis=0, keepdims=True)))
            trn = tr * jax.lax.rsqrt(jnp.sum(tr * tr, axis=0, keepdims=True))

            # cosine-similarity logits: one tiny XLU transpose, one MXU matmul.
            logits = jnp.dot(trn.T, tnn, preferred_element_type=jnp.float32)  # (nmem*P, P)

            # numerically stable exp, stacked over all memories (no per-m loop).
            l3 = logits.reshape(nmem, P, P)
            e3 = jnp.exp(l3 - jnp.max(l3, axis=1, keepdims=True))             # (nmem, P, P)
            e = e3.reshape(nmem * P, P)

            # softmax-weighted projection of the downsampled labels:
            # block-diagonal weights (rows 0..nmem-1 = labels, rows nmem.. = ones)
            # give numerator and denominator in ONE matmul.
            nd = jnp.dot(w_ref[b], e, preferred_element_type=jnp.float32)     # (2*nmem, P)
            z = nd[:nmem, :] / nd[nmem:, :]                                   # (nmem, P), exact divide

            # bilinear upsample for all memories at once.
            pmt = jnp.dot(z, uT, preferred_element_type=jnp.float32)          # (nmem, L)

            mean = jnp.mean(pmt, axis=0, keepdims=True)                       # (1, L)
            var = jnp.sum((pmt - mean) ** 2, axis=0, keepdims=True) / float(nmem - 1)
            certainty = jnp.exp(ALPHA / (1.0 + var) - ALPHA)                  # std**2 == var
            o_ref[b] = certainty * mean + ts_ref[b]

    return kernel


def attention_average_std_scaling(test_scores, train_labels, test_feat, train_feats,
                                  softmax_temp):
    _, nseq, wl, hl = test_scores.shape
    nmem, _, c, wf, hf = train_feats.shape
    assert test_feat.shape == (1, nseq, c, wf, hf)
    assert nmem >= 2, "unbiased std over memories requires nmem >= 2"
    P = wf * hf
    L = wl * hl
    f32 = jnp.float32

    # Separable bilinear-interpolation matrices (exact align_corners=False).
    wdh = _bilinear_weight_matrix(wf, wl)
    wdw = _bilinear_weight_matrix(hf, hl)
    wuh = _bilinear_weight_matrix(wl, wf)
    wuw = _bilinear_weight_matrix(hl, hf)
    dT = jnp.asarray(np.kron(wdh, wdw).T, dtype=f32)   # (L, P)  label downsample (right-mult)
    uT = jnp.asarray(np.kron(wuh, wuw).T, dtype=f32)   # (P, L)  upsample (right-mult)

    # ---- layout glue: lane-dense on P / nmem*P / L; only leading-axis transposes ----
    test_r = test_feat[0].reshape(nseq, c, P).astype(f32)                      # (nseq, c, P)
    train_r = jnp.transpose(train_feats, (1, 2, 0, 3, 4)) \
                 .reshape(nseq, c, nmem * P).astype(f32)                       # (nseq, c, nmem*P)
    lab_r = jnp.transpose(train_labels, (1, 0, 2, 3)).reshape(nseq, nmem, L).astype(f32)

    # Hoisted bilinear label downsample, woven into a block-diagonal weight
    # matrix so the in-kernel softmax numerator+denominator are a single matmul.
    mem_down = jnp.einsum('bml,lp->bmp', lab_r, dT,
                          precision=jax.lax.Precision.HIGHEST)                 # (nseq, nmem, P)
    eye = jnp.eye(nmem, dtype=f32)
    w_numer = (mem_down[:, :, None, :] * eye[None, :, :, None]) \
                 .reshape(nseq, nmem, nmem * P)                                # block-diag labels
    w_denom = jnp.broadcast_to(
        jnp.asarray(np.kron(np.eye(nmem), np.ones((1, P))), f32)[None],
        (nseq, nmem, nmem * P))                                                # block-diag ones
    w_blk = jnp.concatenate([w_numer, w_denom], axis=1)                        # (nseq, 2*nmem, nmem*P)

    ts_r = test_scores.reshape(nseq, 1, L).astype(f32)
    temp_arr = jnp.full((1, 1), softmax_temp, dtype=f32)

    # Grid: one step per TensorCore. v7x (2 TCs) -> 2 parallel steps; v5e/v6e -> 1 step.
    n_steps = 2 if (_tensorcores_per_chip() >= 2 and nseq >= 2 and nseq % 2 == 0) else 1
    bseq = nseq // n_steps

    out_flat = pl.pallas_call(
        _make_kernel(bseq, nmem, P),
        out_shape=jax.ShapeDtypeStruct((nseq, 1, L), f32),
        grid=(n_steps,),
        in_specs=[
            pl.BlockSpec((1, 1), lambda n: (0, 0),
                         memory_space=pltpu.MemorySpace.SMEM),
            pl.BlockSpec((bseq, c, P), lambda n: (n, 0, 0)),
            pl.BlockSpec((bseq, c, nmem * P), lambda n: (n, 0, 0)),
            pl.BlockSpec((bseq, 2 * nmem, nmem * P), lambda n: (n, 0, 0)),
            pl.BlockSpec((P, L), lambda n: (0, 0)),
            pl.BlockSpec((bseq, 1, L), lambda n: (n, 0, 0)),
        ],
        out_specs=pl.BlockSpec((bseq, 1, L), lambda n: (n, 0, 0)),
        compiler_params=pltpu.CompilerParams(dimension_semantics=("parallel",)),
    )(temp_arr, test_r, train_r, w_blk, uT, ts_r)

    return out_flat.reshape(1, nseq, wl, hl)


def _reference(test_scores, train_labels, test_feat, train_feats, softmax_temp):
    """Plain-JAX mirror of the PyTorch forward (for sanity checking)."""
    hp = jax.lax.Precision.HIGHEST
    nmem, nseq, c, wf, hf = train_feats.shape
    _, _, wl, hl = test_scores.shape
    wdh = jnp.asarray(_bilinear_weight_matrix(wf, wl), jnp.float32)
    wdw = jnp.asarray(_bilinear_weight_matrix(hf, hl), jnp.float32)
    wuh = jnp.asarray(_bilinear_weight_matrix(wl, wf), jnp.float32)
    wuw = jnp.asarray(_bilinear_weight_matrix(hl, hf), jnp.float32)

    tr = jnp.transpose(train_feats, (1, 2, 0, 3, 4)).reshape(nseq, c, nmem * wf * hf)
    te = jnp.transpose(test_feat, (1, 2, 0, 3, 4)).reshape(nseq, c, wf * hf)
    trn = tr / jnp.sqrt(jnp.sum(tr * tr, axis=1, keepdims=True))
    ten = te / jnp.sqrt(jnp.sum(te * te, axis=1, keepdims=True))
    sim = jnp.einsum('bij,bik->bjk', ten, trn, precision=hp)
    sim = sim.reshape(nseq, wf * hf, nmem, wf * hf).transpose(2, 0, 1, 3)

    lab_down = jnp.einsum('ij,mnjk,lk->mnil', wdh, train_labels, wdw, precision=hp)
    mem = lab_down.reshape(nmem, nseq, 1, wf * hf)
    p = jax.nn.softmax(softmax_temp * sim, axis=3)
    z = jnp.einsum('mnij,mncj->mnci', p, mem, precision=hp).reshape(nmem, nseq, wf, hf)
    pmt = jnp.einsum('ij,mnjk,lk->mnil', wuh, z, wuw, precision=hp)
    mean = jnp.mean(pmt, axis=0)[None]
    std = jnp.std(pmt, axis=0, ddof=1)[None]
    cert = jnp.exp(ALPHA / (1.0 + std ** 2) - ALPHA)
    return cert * mean + test_scores


if __name__ == "__main__":
    key = jax.random.PRNGKey(0)
    k1, k2, k3, k4 = jax.random.split(key, 4)
    nseq, nmem, c, wf, hf, wl, hl = 2, 3, 8, 8, 8, 16, 16

    test_scores = jax.random.normal(k1, (1, nseq, wl, hl), dtype=jnp.float32)
    train_labels = jax.random.normal(k2, (nmem, nseq, wl, hl), dtype=jnp.float32)
    test_feat = jax.random.normal(k3, (1, nseq, c, wf, hf), dtype=jnp.float32)
    train_feats = jax.random.normal(k4, (nmem, nseq, c, wf, hf), dtype=jnp.float32)

    # deterministic init of nn.Parameter(softmax_temp_init * torch.ones(1))
    softmax_temp = 50.0

    out = attention_average_std_scaling(test_scores, train_labels, test_feat,
                                        train_feats, softmax_temp)
    out = jax.block_until_ready(out)

    ref = _reference(test_scores, train_labels, test_feat, train_feats, softmax_temp)
    assert out.shape == (1, nseq, wl, hl), out.shape
    err = float(np.max(np.abs(np.asarray(out) - np.asarray(ref))))
    assert np.allclose(np.asarray(out), np.asarray(ref), rtol=5e-2, atol=5e-2), err

    print("KERNEL_OK")
</pallas_src>

<mosaic_0001>
module attributes {stable_mosaic.version = 11 : i64} {
  func.func @kernel(%arg0: i32, %arg1: memref<1x1xf32, #tpu.memory_space<smem>>, %arg2: memref<2x8x64xf32, #tpu.memory_space<vmem>>, %arg3: memref<2x8x192xf32, #tpu.memory_space<vmem>>, %arg4: memref<2x6x192xf32, #tpu.memory_space<vmem>>, %arg5: memref<64x256xf32, #tpu.memory_space<vmem>>, %arg6: memref<2x1x256xf32, #tpu.memory_space<vmem>>, %arg7: memref<2x1x256xf32, #tpu.memory_space<vmem>>) attributes {dimension_semantics = [#tpu.dimension_semantics<parallel>], iteration_bounds = array<i64: 1>, scalar_prefetch = 0 : i64, scratch_operands = 0 : i64, tpu.core_type = #tpu.core_type<tc>, window_params = [{transform_indices = @transform_0, window_bounds = array<i64: 1, 1>}, {transform_indices = @transform_1, window_bounds = array<i64: 2, 8, 64>}, {transform_indices = @transform_2, window_bounds = array<i64: 2, 8, 192>}, {transform_indices = @transform_3, window_bounds = array<i64: 2, 6, 192>}, {pipeline_mode = #tpu.pipeline_mode<synchronous>, transform_indices = @transform_4, window_bounds = array<i64: 64, 256>}, {transform_indices = @transform_5, window_bounds = array<i64: 2, 1, 256>}, {transform_indices = @transform_6, window_bounds = array<i64: 2, 1, 256>}]} {
    %c0 = arith.constant 0 : index
    %c0_0 = arith.constant 0 : index
    %0 = memref.load %arg1[%c0, %c0_0] : memref<1x1xf32, #tpu.memory_space<smem>>
    %c0_1 = arith.constant 0 : index
    %c0_2 = arith.constant 0 : index
    %1 = vector.load %arg5[%c0_1, %c0_2] : memref<64x256xf32, #tpu.memory_space<vmem>>, vector<64x256xf32>
    %c0_3 = arith.constant 0 : index
    %c0_4 = arith.constant 0 : index
    %c0_5 = arith.constant 0 : index
    %2 = vector.load %arg2[%c0_3, %c0_4, %c0_5] : memref<2x8x64xf32, #tpu.memory_space<vmem>>, vector<1x8x64xf32>
    %3 = vector.shape_cast %2 : vector<1x8x64xf32> to vector<8x64xf32>
    %c0_6 = arith.constant 0 : index
    %c0_7 = arith.constant 0 : index
    %c0_8 = arith.constant 0 : index
    %4 = vector.load %arg3[%c0_6, %c0_7, %c0_8] : memref<2x8x192xf32, #tpu.memory_space<vmem>>, vector<1x8x192xf32>
    %5 = vector.shape_cast %4 : vector<1x8x192xf32> to vector<8x192xf32>
    %6 = arith.mulf %3, %3 : vector<8x64xf32>
    %cst = arith.constant dense<0.000000e+00> : vector<64xf32>
    %7 = vector.multi_reduction <add>, %6, %cst [0] : vector<8x64xf32> to vector<64xf32>
    %8 = vector.shape_cast %7 : vector<64xf32> to vector<1x64xf32>
    %9 = math.rsqrt %8 : vector<1x64xf32>
    %10 = vector.broadcast %0 : f32 to vector<1x64xf32>
    %11 = arith.mulf %10, %9 : vector<1x64xf32>
    %12 = vector.broadcast %11 : vector<1x64xf32> to vector<8x64xf32>
    %13 = arith.mulf %3, %12 : vector<8x64xf32>
    %14 = arith.mulf %5, %5 : vector<8x192xf32>
    %cst_9 = arith.constant dense<0.000000e+00> : vector<192xf32>
    %15 = vector.multi_reduction <add>, %14, %cst_9 [0] : vector<8x192xf32> to vector<192xf32>
    %16 = vector.shape_cast %15 : vector<192xf32> to vector<1x192xf32>
    %17 = math.rsqrt %16 : vector<1x192xf32>
    %18 = vector.broadcast %17 : vector<1x192xf32> to vector<8x192xf32>
    %19 = arith.mulf %5, %18 : vector<8x192xf32>
    %20 = tpu.transpose %19, [1, 0] : vector<8x192xf32> -> vector<192x8xf32>
    %cst_10 = arith.constant dense<0.000000e+00> : vector<192x64xf32>
    %21 = tpu.matmul %20, %13, %cst_10 {dimension_numbers = #tpu.dot_dimension_numbers<[1], [0], [0], [1], [0, 0, 1, 1], [], []>} : vector<192x8xf32>, vector<8x64xf32>, vector<192x64xf32> -> vector<192x64xf32>
    %22 = vector.shape_cast %21 : vector<192x64xf32> to vector<3x64x64xf32>
    %cst_11 = arith.constant dense<0xFF800000> : vector<3x64xf32>
    %23 = vector.multi_reduction <maximumf>, %22, %cst_11 [1] : vector<3x64x64xf32> to vector<3x64xf32>
    %24 = vector.shape_cast %23 : vector<3x64xf32> to vector<3x1x64xf32>
    %25 = vector.broadcast %24 : vector<3x1x64xf32> to vector<3x64x64xf32>
    %26 = arith.subf %22, %25 : vector<3x64x64xf32>
    %27 = math.exp %26 : vector<3x64x64xf32>
    %28 = vector.shape_cast %27 : vector<3x64x64xf32> to vector<192x64xf32>
    %c0_12 = arith.constant 0 : index
    %c0_13 = arith.constant 0 : index
    %c0_14 = arith.constant 0 : index
    %29 = vector.load %arg4[%c0_12, %c0_13, %c0_14] : memref<2x6x192xf32, #tpu.memory_space<vmem>>, vector<1x6x192xf32>
    %30 = vector.shape_cast %29 : vector<1x6x192xf32> to vector<6x192xf32>
    %cst_15 = arith.constant dense<0.000000e+00> : vector<6x64xf32>
    %31 = tpu.matmul %30, %28, %cst_15 {dimension_numbers = #tpu.dot_dimension_numbers<[1], [0], [0], [1], [0, 0, 1, 1], [], []>} : vector<6x192xf32>, vector<192x64xf32>, vector<6x64xf32> -> vector<6x64xf32>
    %32 = vector.extract_strided_slice %31 {offsets = [0, 0], sizes = [3, 64], strides = [1, 1]} : vector<6x64xf32> to vector<3x64xf32>
    %33 = vector.extract_strided_slice %31 {offsets = [3, 0], sizes = [3, 64], strides = [1, 1]} : vector<6x64xf32> to vector<3x64xf32>
    %34 = arith.divf %32, %33 : vector<3x64xf32>
    %cst_16 = arith.constant dense<0.000000e+00> : vector<3x256xf32>
    %35 = tpu.matmul %34, %1, %cst_16 {dimension_numbers = #tpu.dot_dimension_numbers<[1], [0], [0], [1], [0, 0, 1, 1], [], []>} : vector<3x64xf32>, vector<64x256xf32>, vector<3x256xf32> -> vector<3x256xf32>
    %cst_17 = arith.constant dense<0.000000e+00> : vector<256xf32>
    %36 = vector.multi_reduction <add>, %35, %cst_17 [0] : vector<3x256xf32> to vector<256xf32>
    %37 = vector.shape_cast %36 : vector<256xf32> to vector<1x256xf32>
    %cst_18 = arith.constant 3.000000e+00 : f32
    %38 = vector.broadcast %cst_18 : f32 to vector<1x256xf32>
    %39 = arith.divf %37, %38 : vector<1x256xf32>
    %40 = vector.broadcast %39 : vector<1x256xf32> to vector<3x256xf32>
    %41 = arith.subf %35, %40 : vector<3x256xf32>
    %42 = arith.mulf %41, %41 : vector<3x256xf32>
    %cst_19 = arith.constant dense<0.000000e+00> : vector<256xf32>
    %43 = vector.multi_reduction <add>, %42, %cst_19 [0] : vector<3x256xf32> to vector<256xf32>
    %44 = vector.shape_cast %43 : vector<256xf32> to vector<1x256xf32>
    %cst_20 = arith.constant 2.000000e+00 : f32
    %45 = vector.broadcast %cst_20 : f32 to vector<1x256xf32>
    %46 = arith.divf %44, %45 : vector<1x256xf32>
    %cst_21 = arith.constant 1.000000e+00 : f32
    %47 = vector.broadcast %cst_21 : f32 to vector<1x256xf32>
    %48 = arith.addf %47, %46 : vector<1x256xf32>
    %cst_22 = arith.constant 2.000000e+01 : f32
    %49 = vector.broadcast %cst_22 : f32 to vector<1x256xf32>
    %50 = arith.divf %49, %48 : vector<1x256xf32>
    %cst_23 = arith.constant 2.000000e+01 : f32
    %51 = vector.broadcast %cst_23 : f32 to vector<1x256xf32>
    %52 = arith.subf %50, %51 : vector<1x256xf32>
    %53 = math.exp %52 : vector<1x256xf32>
    %54 = arith.mulf %53, %39 : vector<1x256xf32>
    %c0_24 = arith.constant 0 : index
    %c0_25 = arith.constant 0 : index
    %c0_26 = arith.constant 0 : index
    %55 = vector.load %arg6[%c0_24, %c0_25, %c0_26] : memref<2x1x256xf32, #tpu.memory_space<vmem>>, vector<1x1x256xf32>
    %56 = vector.shape_cast %55 : vector<1x1x256xf32> to vector<1x256xf32>
    %57 = arith.addf %54, %56 : vector<1x256xf32>
    %c0_27 = arith.constant 0 : index
    %c0_28 = arith.constant 0 : index
    %c0_29 = arith.constant 0 : index
    %58 = vector.load %arg7[%c0_27, %c0_28, %c0_29] : memref<2x1x256xf32, #tpu.memory_space<vmem>>, vector<1x1x256xf32>
    %59 = vector.shape_cast %58 : vector<1x1x256xf32> to vector<1x256xf32>
    %60 = vector.shape_cast %57 : vector<1x256xf32> to vector<1x1x256xf32>
    tpu.vector_store %arg7[%c0_27, %c0_28, %c0_29], %60 {strides = array<i32>} : memref<2x1x256xf32, #tpu.memory_space<vmem>>, vector<1x1x256xf32>,
    %c1 = arith.constant 1 : index
    %c0_30 = arith.constant 0 : index
    %c0_31 = arith.constant 0 : index
    %61 = vector.load %arg2[%c1, %c0_30, %c0_31] : memref<2x8x64xf32, #tpu.memory_space<vmem>>, vector<1x8x64xf32>
    %62 = vector.shape_cast %61 : vector<1x8x64xf32> to vector<8x64xf32>
    %c1_32 = arith.constant 1 : index
    %c0_33 = arith.constant 0 : index
    %c0_34 = arith.constant 0 : index
    %63 = vector.load %arg3[%c1_32, %c0_33, %c0_34] : memref<2x8x192xf32, #tpu.memory_space<vmem>>, vector<1x8x192xf32>
    %64 = vector.shape_cast %63 : vector<1x8x192xf32> to vector<8x192xf32>
    %65 = arith.mulf %62, %62 : vector<8x64xf32>
    %cst_35 = arith.constant dense<0.000000e+00> : vector<64xf32>
    %66 = vector.multi_reduction <add>, %65, %cst_35 [0] : vector<8x64xf32> to vector<64xf32>
    %67 = vector.shape_cast %66 : vector<64xf32> to vector<1x64xf32>
    %68 = math.rsqrt %67 : vector<1x64xf32>
    %69 = vector.broadcast %0 : f32 to vector<1x64xf32>
    %70 = arith.mulf %69, %68 : vector<1x64xf32>
    %71 = vector.broadcast %70 : vector<1x64xf32> to vector<8x64xf32>
    %72 = arith.mulf %62, %71 : vector<8x64xf32>
    %73 = arith.mulf %64, %64 : vector<8x192xf32>
    %cst_36 = arith.constant dense<0.000000e+00> : vector<192xf32>
    %74 = vector.multi_reduction <add>, %73, %cst_36 [0] : vector<8x192xf32> to vector<192xf32>
    %75 = vector.shape_cast %74 : vector<192xf32> to vector<1x192xf32>
    %76 = math.rsqrt %75 : vector<1x192xf32>
    %77 = vector.broadcast %76 : vector<1x192xf32> to vector<8x192xf32>
    %78 = arith.mulf %64, %77 : vector<8x192xf32>
    %79 = tpu.transpose %78, [1, 0] : vector<8x192xf32> -> vector<192x8xf32>
    %cst_37 = arith.constant dense<0.000000e+00> : vector<192x64xf32>
    %80 = tpu.matmul %79, %72, %cst_37 {dimension_numbers = #tpu.dot_dimension_numbers<[1], [0], [0], [1], [0, 0, 1, 1], [], []>} : vector<192x8xf32>, vector<8x64xf32>, vector<192x64xf32> -> vector<192x64xf32>
    %81 = vector.shape_cast %80 : vector<192x64xf32> to vector<3x64x64xf32>
    %cst_38 = arith.constant dense<0xFF800000> : vector<3x64xf32>
    %82 = vector.multi_reduction <maximumf>, %81, %cst_38 [1] : vector<3x64x64xf32> to vector<3x64xf32>
    %83 = vector.shape_cast %82 : vector<3x64xf32> to vector<3x1x64xf32>
    %84 = vector.broadcast %83 : vector<3x1x64xf32> to vector<3x64x64xf32>
    %85 = arith.subf %81, %84 : vector<3x64x64xf32>
    %86 = math.exp %85 : vector<3x64x64xf32>
    %87 = vector.shape_cast %86 : vector<3x64x64xf32> to vector<192x64xf32>
    %c1_39 = arith.constant 1 : index
    %c0_40 = arith.constant 0 : index
    %c0_41 = arith.constant 0 : index
    %88 = vector.load %arg4[%c1_39, %c0_40, %c0_41] : memref<2x6x192xf32, #tpu.memory_space<vmem>>, vector<1x6x192xf32>
    %89 = vector.shape_cast %88 : vector<1x6x192xf32> to vector<6x192xf32>
    %cst_42 = arith.constant dense<0.000000e+00> : vector<6x64xf32>
    %90 = tpu.matmul %89, %87, %cst_42 {dimension_numbers = #tpu.dot_dimension_numbers<[1], [0], [0], [1], [0, 0, 1, 1], [], []>} : vector<6x192xf32>, vector<192x64xf32>, vector<6x64xf32> -> vector<6x64xf32>
    %91 = vector.extract_strided_slice %90 {offsets = [0, 0], sizes = [3, 64], strides = [1, 1]} : vector<6x64xf32> to vector<3x64xf32>
    %92 = vector.extract_strided_slice %90 {offsets = [3, 0], sizes = [3, 64], strides = [1, 1]} : vector<6x64xf32> to vector<3x64xf32>
    %93 = arith.divf %91, %92 : vector<3x64xf32>
    %cst_43 = arith.constant dense<0.000000e+00> : vector<3x256xf32>
    %94 = tpu.matmul %93, %1, %cst_43 {dimension_numbers = #tpu.dot_dimension_numbers<[1], [0], [0], [1], [0, 0, 1, 1], [], []>} : vector<3x64xf32>, vector<64x256xf32>, vector<3x256xf32> -> vector<3x256xf32>
    %cst_44 = arith.constant dense<0.000000e+00> : vector<256xf32>
    %95 = vector.multi_reduction <add>, %94, %cst_44 [0] : vector<3x256xf32> to vector<256xf32>
    %96 = vector.shape_cast %95 : vector<256xf32> to vector<1x256xf32>
    %cst_45 = arith.constant 3.000000e+00 : f32
    %97 = vector.broadcast %cst_45 : f32 to vector<1x256xf32>
    %98 = arith.divf %96, %97 : vector<1x256xf32>
    %99 = vector.broadcast %98 : vector<1x256xf32> to vector<3x256xf32>
    %100 = arith.subf %94, %99 : vector<3x256xf32>
    %101 = arith.mulf %100, %100 : vector<3x256xf32>
    %cst_46 = arith.constant dense<0.000000e+00> : vector<256xf32>
    %102 = vector.multi_reduction <add>, %101, %cst_46 [0] : vector<3x256xf32> to vector<256xf32>
    %103 = vector.shape_cast %102 : vector<256xf32> to vector<1x256xf32>
    %cst_47 = arith.constant 2.000000e+00 : f32
    %104 = vector.broadcast %cst_47 : f32 to vector<1x256xf32>
    %105 = arith.divf %103, %104 : vector<1x256xf32>
    %cst_48 = arith.constant 1.000000e+00 : f32
    %106 = vector.broadcast %cst_48 : f32 to vector<1x256xf32>
    %107 = arith.addf %106, %105 : vector<1x256xf32>
    %cst_49 = arith.constant 2.000000e+01 : f32
    %108 = vector.broadcast %cst_49 : f32 to vector<1x256xf32>
    %109 = arith.divf %108, %107 : vector<1x256xf32>
    %cst_50 = arith.constant 2.000000e+01 : f32
    %110 = vector.broadcast %cst_50 : f32 to vector<1x256xf32>
    %111 = arith.subf %109, %110 : vector<1x256xf32>
    %112 = math.exp %111 : vector<1x256xf32>
    %113 = arith.mulf %112, %98 : vector<1x256xf32>
    %c1_51 = arith.constant 1 : index
    %c0_52 = arith.constant 0 : index
    %c0_53 = arith.constant 0 : index
    %114 = vector.load %arg6[%c1_51, %c0_52, %c0_53] : memref<2x1x256xf32, #tpu.memory_space<vmem>>, vector<1x1x256xf32>
    %115 = vector.shape_cast %114 : vector<1x1x256xf32> to vector<1x256xf32>
    %116 = arith.addf %113, %115 : vector<1x256xf32>
    %c1_54 = arith.constant 1 : index
    %c0_55 = arith.constant 0 : index
    %c0_56 = arith.constant 0 : index
    %117 = vector.load %arg7[%c1_54, %c0_55, %c0_56] : memref<2x1x256xf32, #tpu.memory_space<vmem>>, vector<1x1x256xf32>
    %118 = vector.shape_cast %117 : vector<1x1x256xf32> to vector<1x256xf32>
    %119 = vector.shape_cast %116 : vector<1x256xf32> to vector<1x1x256xf32>
    tpu.vector_store %arg7[%c1_54, %c0_55, %c0_56], %119 {strides = array<i32>} : memref<2x1x256xf32, #tpu.memory_space<vmem>>, vector<1x1x256xf32>,
    return
  }
  func.func @transform_0(%arg0: i32) -> (i32, i32) {
    %c0_i32 = arith.constant 0 : i32
    %c0_i32_0 = arith.constant 0 : i32
    %c0_i32_1 = arith.constant 0 : i32
    return %c0_i32, %c0_i32_0 : i32, i32
  }
  func.func @transform_1(%arg0: i32) -> (i32, i32, i32) {
    %c0_i32 = arith.constant 0 : i32
    %c0_i32_0 = arith.constant 0 : i32
    %c0_i32_1 = arith.constant 0 : i32
    return %arg0, %c0_i32, %c0_i32_0 : i32, i32, i32
  }
  func.func @transform_2(%arg0: i32) -> (i32, i32, i32) {
    %c0_i32 = arith.constant 0 : i32
    %c0_i32_0 = arith.constant 0 : i32
    %c0_i32_1 = arith.constant 0 : i32
    return %arg0, %c0_i32, %c0_i32_0 : i32, i32, i32
  }
  func.func @transform_3(%arg0: i32) -> (i32, i32, i32) {
    %c0_i32 = arith.constant 0 : i32
    %c0_i32_0 = arith.constant 0 : i32
    %c0_i32_1 = arith.constant 0 : i32
    return %arg0, %c0_i32, %c0_i32_0 : i32, i32, i32
  }
  func.func @transform_4(%arg0: i32) -> (i32, i32) {
    %c0_i32 = arith.constant 0 : i32
    %c0_i32_0 = arith.constant 0 : i32
    %c0_i32_1 = arith.constant 0 : i32
    return %c0_i32, %c0_i32_0 : i32, i32
  }
  func.func @transform_5(%arg0: i32) -> (i32, i32, i32) {
    %c0_i32 = arith.constant 0 : i32
    %c0_i32_0 = arith.constant 0 : i32
    %c0_i32_1 = arith.constant 0 : i32
    return %arg0, %c0_i32, %c0_i32_0 : i32, i32, i32
  }
  func.func @transform_6(%arg0: i32) -> (i32, i32, i32) {
    %c0_i32 = arith.constant 0 : i32
    %c0_i32_0 = arith.constant 0 : i32
    %c0_i32_1 = arith.constant 0 : i32
    return %arg0, %c0_i32, %c0_i32_0 : i32, i32, i32
  }
}

</mosaic_0001>

<bundles_post_ra>
// kernel: tpu_custom_call.1
= control target key start
LH: loop header
LB: loop body
LE: loop exit
PB: predicated region body
PF: predicated region fallthrough
CT: control target
= control target key end

     0   :  { %12 = vsyncpa [#allocation4], 0  ;;  %s2477_s0 = inlined_call_operand.<no memory space> [shape: f32[1,1], index: 0, kind: input, shape index: {}]   ;;  %s2478_s1 = inlined_call_operand.vmem [shape: f32[2,8,64], index: 1, kind: input, shape index: {}]   ;;  %s2479_s2 = inlined_call_operand.vmem [shape: f32[2,8,192], index: 2, kind: input, shape index: {}]   ;;  %s2480_s3 = inlined_call_operand.vmem [shape: f32[2,6,192], index: 3, kind: input, shape index: {}]   ;;  %s2481_s4 = inlined_call_operand.hbm [shape: f32[64,256], index: 4, kind: input, shape index: {}]   ;;  %s2482_s5 = inlined_call_operand.vmem [shape: f32[2,1,256], index: 5, kind: input, shape index: {}]   ;;  %s2483_s6 = inlined_call_operand.hbm [shape: f32[2,1,256], index: 6, kind: output, shape index: {}]  }
   0x1   :  { %13 = vsyncpa [#allocation5], 0  ;;  %s2017_s21 = smov [#allocation3]   ;;  %s1969_s25 = scalar_lea.hbm %s2481_s4, 2048 }
   0x2   :  { %s27_s22 = sshll.u32 %s2017_s21, 4  ;;  %p1970_p0 = scmp.ne.s32.totalorder %s2481_s4, %s1969_s25  ;;  %s28_s22 = int_to_ptr.vmem [resolvable:$true] %s27_s22 }
   0x3   :  { %p1973_p1 = scmp.lt.u32.totalorder %s1969_s25, %s2481_s4 }
   0x5   :  { %p1975_p2 = pnand %p1973_p1, %p1970_p0 }
   0x7   :  { %1978 = shalt.err (!%p1975_p2)
}
   0x8   :  { %s1979_s30 = scalar_lea.vmem %s28_s22, 2048  ;;  %p1984_p4 = scmp.lt.s32.totalorder %s28_s22, %s28_s22 }
   0x9   :  { %p1980_p3 = scmp.ne.s32.totalorder %s28_s22, %s1979_s30  ;;  %p1985_p5 = scmp.lt.s32.totalorder %s1979_s30, %s1979_s30 }
   0xb   :  { %p1986_p6 = por %p1985_p5, %p1984_p4 }
   0xd   :  { %p1987_p7 = pnand %p1986_p6, %p1980_p3 }
   0xf   :  { %1990 = shalt.err (!%p1987_p7)
}
  0x10   :  { %s2018_s7 = smov 256   ;;  %s2019_s8 = smov 16  }
  0x11   :  { %33 = dma.hbm_to_vmem [thread:$0]  %s2481_s4, 2048, %s28_s22, [#allocation4], %s2018_s7, %s2018_s7, %s2019_s8  }
  0x12   :  { %2013 = dma.done.wait [#allocation4], 2048  }
  0x13   :  { %2014 = vsyncadd [#allocation4], 4294965248  ;;  %v57_v0 = vld [vmem:[%s2479_s2] sm:$0xff]  ;;  %vm60_vm0 = vcmask 523264   ;;  %v69_v19 = vstv %s2477_s0  ;;  %v58_v23 = vld [vmem:[%s2479_s2 + $0x8] sm:$0xff]  ;;  %vm155_vm1 = vcmask 64512  }
  0x14   :  { %v56_v1 = vld [vmem:[%s2478_s1] sm:$0xff]  ;;  %v72_v2 = vmul.f32 %v57_v0, %v57_v0  ;;  %v73_v24 = vmul.f32 %v58_v23, %v58_v23  ;;  %v1569_v34 = vld [vmem:[%s2479_s2 + $0x10] sm:$0xff]  ;;  %vm702_vm2 = vcmask 1042432   ;;  %s2023_s12 = smov [#allocation6]  }
  0x15   :  { %v59_v3 = vmul.f32 %v56_v1, %v56_v1  ;;  %v808_v35 = vmul.f32 %v1569_v34, %v1569_v34  ;;  %s1528_s13 = sshll.u32 %s2023_s12, 4  ;;  %s1529_s13 = int_to_ptr.vmem [resolvable:$true] %s1528_s13 }
  0x16   :  { %v74_v4 = vrot.slane %v72_v2, 4  ;;  %v80_v25 = vsel %vm60_vm0, %v73_v24, 0.0  ;;  %p1996_p9 = scmp.lt.s32.totalorder %s1529_s13, %s1529_s13 }
  0x17   :  { %v61_v5 = vsel %vm60_vm0, %v59_v3, 0.0  ;;  %v81_v26 = vrot.slane %v80_v25, 4  ;;  %v810_v36 = vrot.slane %v808_v35, 4  ;;  %v1570_v3 = vld [vmem:[%s2479_s2 + $0x18] sm:$0xff] }
  0x18   :  { %v62_v6 = vrot.slane %v61_v5, 4  ;;  %v75_v7 = vadd.f32 %v74_v4, %v72_v2  ;;  %v809_v4 = vmul.f32 %v1570_v3, %v1570_v3 }
  0x19   :  { %v82_v27 = vadd.f32 %v81_v26, %v80_v25  ;;  %v811_v37 = vadd.f32 %v810_v36, %v808_v35  ;;  %v549_v26 = vld [vmem:[%s2480_s3 + $0x8] sm:$0x3f] }
  0x1a   :  { %v63_v8 = vadd.f32 %v62_v6, %v61_v5  ;;  %v76_v9 = vrot.slane %v75_v7, 2  ;;  %v816_v6 = vsel %vm60_vm0, %v809_v4, 0.0  ;;  %1564 = vmatprep.mubr.msk.f32.mxu1 %vm60_vm0, %v549_v26 }
  0x1b   :  { %v83_v28 = vrot.slane %v82_v27, 2  ;;  %v812_v38 = vrot.slane %v811_v37, 2 }
  0x1c   :  { %v64_v10 = vrot.slane %v63_v8, 2  ;;  %v77_v11 = vadd.f32 %v76_v9, %v75_v7  ;;  %v817_v7 = vrot.slane %v816_v6, 4 }
  0x1d   :  { %v84_v29 = vadd.f32 %v83_v28, %v82_v27  ;;  %v813_v39 = vadd.f32 %v812_v38, %v811_v37 }
  0x1e   :  { %v65_v12 = vadd.f32 %v64_v10, %v63_v8  ;;  %v78_v13 = vrot.slane %v77_v11, 1  ;;  %v818_v8 = vadd.f32 %v817_v7, %v816_v6 }
  0x1f   :  { %v85_v30 = vrot.slane %v84_v29, 1  ;;  %v814_v40 = vrot.slane %v813_v39, 1 }
  0x20   :  { %v66_v14 = vrot.slane %v65_v12, 1  ;;  %v79_v15 = vadd.f32 %v78_v13, %v77_v11  ;;  %v819_v9 = vrot.slane %v818_v8, 2 }
  0x21   :  { %v86_v31 = vadd.f32 %v85_v30, %v84_v29  ;;  %v815_v41 = vadd.f32 %v814_v40, %v813_v39 }
  0x22   :  { %v67_v16 = vadd.f32 %v66_v14, %v65_v12  ;;  %1841 = vrsqrt.f32 %v79_v15  ;;  %v820_v10 = vadd.f32 %v819_v9, %v818_v8  ;;  %v2020_v15 = vmov 0.0|0.0  }
  0x23   :  { %1728 = vmatprep.subr.bf16.mxu1 %v2020_v15 }
  0x24   :  { %1843 = vrsqrt.f32 %v67_v16  ;;  %v821_v11 = vrot.slane %v820_v10, 1 }
  0x25   :  { %1845 = vrsqrt.f32 %v86_v31 }
  0x26   :  { %1847 = vrsqrt.f32 %v815_v41  ;;  %v822_v12 = vadd.f32 %v821_v11, %v820_v10 }
  0x28   :  { %1849 = vrsqrt.f32 %v822_v12 }
  0x2c   :  { %v1842_v17 = vpop.eup %1841 }
  0x2d   :  { %v89_v18 = vmul.f32 %v1842_v17, %v57_v0 }
  0x2e   :  { %v1844_v20 = vpop.eup %1843 }
  0x2f   :  { %91 = vxpose.xlu0.b32.start.end [1/1] (short) %v89_v18, 128  ;;  %v70_v21 = vmul.f32 %v1844_v20, %v69_v19  ;;  %v1846_v32 = vpop.eup %1845 }
  0x30   :  { %v90_v33 = vmul.f32 %v1846_v32, %v58_v23  ;;  %v1848_v42 = vpop.eup %1847 }
  0x31   :  { %v71_v22 = vmul.f32 %v70_v21, %v56_v1  ;;  %v825_v43 = vmul.f32 %v1848_v42, %v1569_v34 }
  0x32   :  { %v1850_v13 = vpop.eup %1849 }
  0x33   :  { %1652 = vmatprep.subr.mxu0 %v71_v22  ;;  %827 = vxpose.xlu1.b32.start.end [1/1] (short) %v825_v43, 128  ;;  %v826_v14 = vmul.f32 %v1850_v13, %v1570_v3 }
  0x34   :  { %1653 = vmatpush3.msra.mxu0 %v71_v22 }
  0x6c   :  { %123 = vxpose.xlu0.b32.start.end [1/1] (short) (narrow) %v90_v33, 64 }
  0x70   :  { %859 = vxpose.xlu1.b32.start.end [1/1] (short) (narrow) %v826_v14, 64 }
  0xaf   :  { %v107_v44 = vpop.trf.xlu0 }
  0xb0   :  { %1654 = vmatprep.mubr.msk.f32.mxu0 %vm155_vm1, %v107_v44 }
  0xb3   :  { %v108_v45 = vpop.trf.xlu0  ;;  %v2153_v8 = vpop.trf.xlu1 }
  0xb4   :  { %1655 = vmatmul.mubr.msk.f32.vlgmr.msra.gmra.mrb[0].mxu0 %vm155_vm1, %v108_v45 }
  0xb7   :  { %v109_v46 = vpop.trf.xlu0 }
  0xb8   :  { %1657 = vmatprep.mubr.msk.f32.mxu0 %vm155_vm1, %v109_v46 }
  0xbb   :  { %v110_v47 = vpop.trf.xlu0 }
  0xbc   :  { %1658 = vmatmul.mubr.msk.f32.gmra.mrb[2].mxu0 %vm155_vm1, %v110_v47 }
  0xbf   :  { %v111_v48 = vpop.trf.xlu0 }
  0xc0   :  { %1660 = vmatprep.mubr.msk.f32.mxu0 %vm155_vm1, %v111_v48 }
  0xc3   :  { %v112_v49 = vpop.trf.xlu0 }
  0xc4   :  { %1661 = vmatmul.mubr.msk.f32.gmra.mrb[4].mxu0 %vm155_vm1, %v112_v49 }
  0xc7   :  { %v113_v50 = vpop.trf.xlu0 }
  0xc8   :  { %1663 = vmatprep.mubr.msk.f32.mxu0 %vm155_vm1, %v113_v50 }
  0xcb   :  { %v114_v51 = vpop.trf.xlu0 }
  0xcc   :  { %1664 = vmatmul.mubr.msk.f32.gmra.mrb[6].mxu0 %vm155_vm1, %v114_v51 }
  0xcf   :  { %v115_v52 = vpop.trf.xlu0 }
  0xd0   :  { %1666 = vmatprep.mubr.msk.f32.mxu0 %vm155_vm1, %v115_v52 }
  0xd3   :  { %v116_v53 = vpop.trf.xlu0 }
  0xd4   :  { %1667 = vmatmul.mubr.msk.f32.gmra.mrb[8].mxu0 %vm155_vm1, %v116_v53 }
  0xd7   :  { %v117_v54 = vpop.trf.xlu0 }
  0xd8   :  { %1669 = vmatprep.mubr.msk.f32.mxu0 %vm155_vm1, %v117_v54 }
  0xdb   :  { %v118_v55 = vpop.trf.xlu0 }
  0xdc   :  { %1670 = vmatmul.mubr.msk.f32.gmra.mrb[10].mxu0 %vm155_vm1, %v118_v55 }
  0xdf   :  { %v119_v56 = vpop.trf.xlu0 }
  0xe0   :  { %1672 = vmatprep.mubr.msk.f32.mxu0 %vm155_vm1, %v119_v56 }
  0xe3   :  { %v120_v57 = vpop.trf.xlu0 }
  0xe4   :  { %1673 = vmatmul.mubr.msk.f32.gmra.mrb[12].mxu0 %vm155_vm1, %v120_v57 }
  0xe7   :  { %v121_v58 = vpop.trf.xlu0 }
  0xe8   :  { %1675 = vmatprep.mubr.msk.f32.mxu0 %vm155_vm1, %v121_v58 }
  0xeb   :  { %v122_v59 = vpop.trf.xlu0 }
  0xec   :  { %1676 = vmatmul.mubr.msk.f32.gmra.mrb[14].mxu0 %vm155_vm1, %v122_v59 }
  0xef   :  { %v139_v60 = vpop.trf.xlu0 }
  0xf0   :  { %1678 = vmatprep.mubr.msk.f32.mxu0 %vm155_vm1, %v139_v60 }
  0xf3   :  { %v140_v61 = vpop.trf.xlu0 }
  0xf4   :  { %1679 = vmatmul.mubr.msk.f32.gmra.mrb[16].mxu0 %vm155_vm1, %v140_v61 }
  0xf7   :  { %v141_v62 = vpop.trf.xlu0 }
  0xf8   :  { %1681 = vmatprep.mubr.msk.f32.mxu0 %vm155_vm1, %v141_v62 }
  0xfb   :  { %v142_v63 = vpop.trf.xlu0 }
  0xfc   :  { %1682 = vmatmul.mubr.msk.f32.gmra.mrb[18].mxu0 %vm155_vm1, %v142_v63 }
  0xff   :  { %v143_v0 = vpop.trf.xlu0 }
 0x100   :  { %1684 = vmatprep.mubr.msk.f32.mxu0 %vm155_vm1, %v143_v0 }
 0x103   :  { %v144_v1 = vpop.trf.xlu0 }
 0x104   :  { %1685 = vmatmul.mubr.msk.f32.gmra.mrb[20].mxu0 %vm155_vm1, %v144_v1 }
 0x107   :  { %v145_v2 = vpop.trf.xlu0 }
 0x108   :  { %1687 = vmatprep.mubr.msk.f32.mxu0 %vm155_vm1, %v145_v2 }
 0x10b   :  { %v146_v5 = vpop.trf.xlu0 }
 0x10c   :  { %1688 = vmatmul.mubr.msk.f32.gmra.mrb[22].mxu0 %vm155_vm1, %v146_v5 }
 0x187   :  { %v1656_v16 = vpop.f32.mrb[0].mxu0 }
 0x188   :  { %v294_v17 = vpop.f32.mrb[1].mxu0  ;;  %v414_v20 = vsel %vm60_vm0, %v1656_v16, -inf }
 0x189   :  { %v413_v23 = vsel %vm60_vm0, %v294_v17, -inf }
 0x18f   :  { %v1659_v18 = vpop.f32.mrb[2].mxu0 }
 0x190   :  { %v417_v21 = vsel %vm60_vm0, %v1659_v18, -inf  ;;  %v304_v22 = vpop.f32.mrb[3].mxu0 }
 0x191   :  { %v418_v24 = vmax.f32 %v414_v20, %v417_v21  ;;  %v415_v25 = vsel %vm60_vm0, %v304_v22, -inf }
 0x192   :  { %v416_v27 = vmax.f32 %v413_v23, %v415_v25 }
 0x197   :  { %v1662_v28 = vpop.f32.mrb[4].mxu0 }
 0x198   :  { %v421_v29 = vsel %vm60_vm0, %v1662_v28, -inf  ;;  %v314_v30 = vpop.f32.mrb[5].mxu0 }
 0x199   :  { %v422_v31 = vmax.f32 %v418_v24, %v421_v29  ;;  %v419_v32 = vsel %vm60_vm0, %v314_v30, -inf }
 0x19a   :  { %v420_v33 = vmax.f32 %v416_v27, %v419_v32 }
 0x19f   :  { %v1665_v34 = vpop.f32.mrb[6].mxu0 }
 0x1a0   :  { %v425_v35 = vsel %vm60_vm0, %v1665_v34, -inf  ;;  %v324_v36 = vpop.f32.mrb[7].mxu0 }
 0x1a1   :  { %v426_v37 = vmax.f32 %v422_v31, %v425_v35  ;;  %v423_v38 = vsel %vm60_vm0, %v324_v36, -inf }
 0x1a2   :  { %v424_v39 = vmax.f32 %v420_v33, %v423_v38 }
 0x1a4   :  { %v427_v40 = vmax.f32 %v424_v39, %v426_v37 }
 0x1a6   :  { %v428_v41 = vrot.slane %v427_v40, 4 }
 0x1a7   :  { %v2135_v42 = vpop.f32.mrb[8].mxu0 }
 0x1a8   :  { %v429_v43 = vmax.f32 %v427_v40, %v428_v41  ;;  %v2137_v44 = vpop.f32.mrb[9].mxu0  ;;  %v435_v50 = vsel %vm60_vm0, %v2135_v42, -inf }
 0x1a9   :  { %v434_v53 = vsel %vm60_vm0, %v2137_v44, -inf }
 0x1aa   :  { %v430_v45 = vrot.slane %v429_v43, 2 }
 0x1ac   :  { %v431_v46 = vmax.f32 %v429_v43, %v430_v45 }
 0x1ae   :  { %v432_v47 = vrot.slane %v431_v46, 1 }
 0x1af   :  { %v2139_v48 = vpop.f32.mrb[10].mxu0 }
 0x1b0   :  { %v433_v49 = vmax.f32 %v431_v46, %v432_v47  ;;  %v438_v51 = vsel %vm60_vm0, %v2139_v48, -inf  ;;  %v2145_v52 = vpop.f32.mrb[11].mxu0 }
 0x1b1   :  { %v439_v54 = vmax.f32 %v435_v50, %v438_v51  ;;  %v436_v55 = vsel %vm60_vm0, %v2145_v52, -inf }
 0x1b2   :  { %v482_v56 = vsub.f32 %v324_v36, %v433_v49  ;;  %v437_v57 = vmax.f32 %v434_v53, %v436_v55  ;;  %v476_v58 = vsub.f32 %v294_v17, %v433_v49  ;;  %v477_v59 = vsub.f32 %v1656_v16, %v433_v49  ;;  %v2161_v17 = vpop.trf.xlu1 }
 0x1b3   :  { %v478_v60 = vsub.f32 %v304_v22, %v433_v49  ;;  %v479_v61 = vsub.f32 %v1659_v18, %v433_v49  ;;  %v480_v62 = vsub.f32 %v314_v30, %v433_v49  ;;  %v481_v63 = vsub.f32 %v1662_v28, %v433_v49 }
 0x1b4   :  { %v512_v0 = vmul.f32 1.442695, %v482_v56  ;;  %v500_v1 = vmul.f32 1.442695, %v476_v58  ;;  %v502_v2 = vmul.f32 1.442695, %v477_v59  ;;  %v483_v3 = vsub.f32 %v1665_v34, %v433_v49 }
 0x1b5   :  { %v504_v4 = vmul.f32 1.442695, %v478_v60  ;;  %v506_v5 = vmul.f32 1.442695, %v479_v61  ;;  %v508_v7 = vmul.f32 1.442695, %v480_v62 }
 0x1b6   :  { %1851 = vpow2.f32 %v512_v0  ;;  %v510_v11 = vmul.f32 1.442695, %v481_v63  ;;  %v514_v14 = vmul.f32 1.442695, %v483_v3  ;;  %v2168_v30 = vpop.trf.xlu1 }
 0x1b7   :  { %v2151_v6 = vpop.f32.mrb[12].mxu0  ;;  %1853 = vpow2.f32 %v500_v1 }
 0x1b8   :  { %v442_v9 = vsel %vm60_vm0, %v2151_v6, -inf  ;;  %v2157_v10 = vpop.f32.mrb[13].mxu0  ;;  %1855 = vpow2.f32 %v502_v2 }
 0x1b9   :  { %v443_v12 = vmax.f32 %v439_v54, %v442_v9  ;;  %v440_v13 = vsel %vm60_vm0, %v2157_v10, -inf  ;;  %1857 = vpow2.f32 %v504_v4  ;;  %v2203_v4 = vld [vmem:[%s2478_s1 + $0x8] sm:$0xff] }
 0x1ba   :  { %v441_v16 = vmax.f32 %v437_v57, %v440_v13  ;;  %1859 = vpow2.f32 %v506_v5  ;;  %v2175_v45 = vpop.trf.xlu1 }
 0x1bb   :  { %1861 = vpow2.f32 %v508_v7 }
 0x1bc   :  { %1863 = vpow2.f32 %v510_v11 }
 0x1bd   :  { %1865 = vpow2.f32 %v514_v14 }
 0x1be   :  { %v2181_v51 = vpop.trf.xlu1 }
 0x1bf   :  { %v2163_v18 = vpop.f32.mrb[14].mxu0 }
 0x1c0   :  { %v1852_v20 = vpop.eup %1851  ;;  %v446_v21 = vsel %vm60_vm0, %v2163_v18, -inf  ;;  %v364_v22 = vpop.f32.mrb[15].mxu0 }
 0x1c1   :  { %v1854_v23 = vpop.eup %1853  ;;  %v447_v24 = vmax.f32 %v443_v12, %v446_v21  ;;  %v444_v25 = vsel %vm60_vm0, %v364_v22, -inf }
 0x1c2   :  { %v1856_v26 = vpop.eup %1855  ;;  %v445_v27 = vmax.f32 %v441_v16, %v444_v25 }
 0x1c3   :  { %v1858_v28 = vpop.eup %1857  ;;  %v1729_v29 = vpack.c.bf16 %v1856_v26, %v1854_v23 }
 0x1c4   :  { %v1860_v31 = vpop.eup %1859  ;;  %v448_v32 = vmax.f32 %v445_v27, %v447_v24 }
 0x1c5   :  { %v1862_v33 = vpop.eup %1861  ;;  %1730 = vmatpush1.bf16.msra.mxu1 %v1729_v29  ;;  %v1732_v34 = vpack.c.bf16 %v1860_v31, %v1858_v28 }
 0x1c6   :  { %v1864_v35 = vpop.eup %1863  ;;  %v449_v36 = vrot.slane %v448_v32, 4  ;;  %1731 = vmatprep.subr.bf16.mxu1 %v2020_v15 }
 0x1c7   :  { %v1866_v37 = vpop.eup %1865  ;;  %v2171_v38 = vpop.f32.mrb[16].mxu0  ;;  %v1735_v39 = vpack.c.bf16 %v1864_v35, %v1862_v33 }
 0x1c8   :  { %v450_v40 = vmax.f32 %v448_v32, %v449_v36  ;;  %v2173_v41 = vpop.f32.mrb[17].mxu0  ;;  %v1738_v43 = vpack.c.bf16 %v1866_v37, %v1852_v20  ;;  %v456_v54 = vsel %vm60_vm0, %v2171_v38, -inf }
 0x1c9   :  { %1733 = vmatpush1.bf16.msra.mxu1 %v1732_v34  ;;  %v455_v57 = vsel %vm60_vm0, %v2173_v41, -inf }
 0x1ca   :  { %v451_v46 = vrot.slane %v450_v40, 2  ;;  %1734 = vmatprep.subr.bf16.mxu1 %v2020_v15 }
 0x1cc   :  { %v452_v47 = vmax.f32 %v450_v40, %v451_v46 }
 0x1cd   :  { %1736 = vmatpush1.bf16.msra.mxu1 %v1735_v39 }
 0x1ce   :  { %v453_v49 = vrot.slane %v452_v47, 1  ;;  %1737 = vmatprep.subr.bf16.mxu1 %v2020_v15 }
 0x1cf   :  { %v2179_v50 = vpop.f32.mrb[18].mxu0 }
 0x1d0   :  { %v454_v53 = vmax.f32 %v452_v47, %v453_v49  ;;  %v459_v55 = vsel %vm60_vm0, %v2179_v50, -inf  ;;  %v2187_v56 = vpop.f32.mrb[19].mxu0 }
 0x1d1   :  { %v460_v58 = vmax.f32 %v456_v54, %v459_v55  ;;  %1739 = vmatpush1.bf16.msra.mxu1 %v1738_v43  ;;  %v457_v59 = vsel %vm60_vm0, %v2187_v56, -inf }
 0x1d2   :  { %v490_v60 = vsub.f32 %v364_v22, %v454_v53  ;;  %v458_v61 = vmax.f32 %v455_v57, %v457_v59  ;;  %1740 = vmatprep.subr.bf16.mxu1 %v2020_v15  ;;  %v484_v62 = vsub.f32 %v2137_v44, %v454_v53  ;;  %v485_v63 = vsub.f32 %v2135_v42, %v454_v53  ;;  %v2206_v42 = vpop.trf.xlu1 }
 0x1d3   :  { %v486_v0 = vsub.f32 %v2145_v52, %v454_v53  ;;  %v487_v1 = vsub.f32 %v2139_v48, %v454_v53  ;;  %v488_v2 = vsub.f32 %v2157_v10, %v454_v53  ;;  %v489_v3 = vsub.f32 %v2151_v6, %v454_v53 }
 0x1d4   :  { %v528_v5 = vmul.f32 1.442695, %v490_v60  ;;  %v516_v7 = vmul.f32 1.442695, %v484_v62  ;;  %v518_v9 = vmul.f32 1.442695, %v485_v63  ;;  %v491_v44 = vsub.f32 %v2163_v18, %v454_v53 }
 0x1d5   :  { %v520_v11 = vmul.f32 1.442695, %v486_v0  ;;  %v522_v52 = vmul.f32 1.442695, %v487_v1  ;;  %v797_v48 = vmul.f32 %v2203_v4, %v2203_v4  ;;  %v524_v6 = vmul.f32 1.442695, %v488_v2 }
 0x1d6   :  { %1867 = vpow2.f32 %v528_v5  ;;  %v526_v14 = vmul.f32 1.442695, %v489_v3  ;;  %v530_v20 = vmul.f32 1.442695, %v491_v44  ;;  %v2219_v23 = vpop.trf.xlu1 }
 0x1d7   :  { %v2210_v10 = vpop.f32.mrb[20].mxu0  ;;  %1869 = vpow2.f32 %v516_v7  ;;  %v798_v22 = vsel %vm60_vm0, %v797_v48, 0.0 }
 0x1d8   :  { %v463_v12 = vsel %vm60_vm0, %v2210_v10, -inf  ;;  %v2214_v13 = vpop.f32.mrb[21].mxu0  ;;  %1871 = vpow2.f32 %v518_v9  ;;  %v799_v24 = vrot.slane %v798_v22, 4 }
 0x1d9   :  { %v464_v16 = vmax.f32 %v460_v58, %v463_v12  ;;  %v461_v18 = vsel %vm60_vm0, %v2214_v13, -inf  ;;  %1873 = vpow2.f32 %v520_v11 }
 0x1da   :  { %v462_v21 = vmax.f32 %v458_v61, %v461_v18  ;;  %1875 = vpow2.f32 %v522_v52  ;;  %v2223_v33 = vpop.trf.xlu1  ;;  %v800_v34 = vadd.f32 %v799_v24, %v798_v22 }
 0x1db   :  { %1877 = vpow2.f32 %v524_v6 }
 0x1dc   :  { %1879 = vpow2.f32 %v526_v14  ;;  %v801_v49 = vrot.slane %v800_v34, 2 }
 0x1dd   :  { %1881 = vpow2.f32 %v530_v20 }
 0x1de   :  { %v2226_v58 = vpop.trf.xlu1  ;;  %v802_v61 = vadd.f32 %v801_v49, %v800_v34 }
 0x1df   :  { %v1689_v25 = vpop.f32.mrb[22].mxu0 }
 0x1e0   :  { %v1868_v26 = vpop.eup %1867  ;;  %v467_v27 = vsel %vm60_vm0, %v1689_v25, -inf  ;;  %v404_v28 = vpop.f32.mrb[23].mxu0  ;;  %v803_v1 = vrot.slane %v802_v61, 1 }
 0x1e1   :  { %v1870_v29 = vpop.eup %1869  ;;  %v468_v31 = vmax.f32 %v464_v16, %v467_v27  ;;  %v465_v32 = vsel %vm60_vm0, %v404_v28, -inf }
 0x1e2   :  { %v1872_v35 = vpop.eup %1871  ;;  %v466_v36 = vmax.f32 %v462_v21, %v465_v32  ;;  %v2229_v0 = vpop.trf.xlu1  ;;  %v804_v5 = vadd.f32 %v803_v1, %v802_v61  ;;  %v44_v61 = vld [vmem:[#allocation3 + $0x20] sm:$0xff]  ;;  %v51_v1 = vld [vmem:[#allocation3 + $0x58] sm:$0xff] }
 0x1e3   :  { %v1874_v37 = vpop.eup %1873  ;;  %v1741_v39 = vpack.c.bf16 %v1872_v35, %v1870_v29 }
 0x1e4   :  { %v1876_v40 = vpop.eup %1875  ;;  %v469_v43 = vmax.f32 %v466_v36, %v468_v31  ;;  %1883 = vrsqrt.f32 %v804_v5  ;;  %v50_v5 = vld [vmem:[#allocation3 + $0x50] sm:$0xff] }
 0x1e5   :  { %v1878_v46 = vpop.eup %1877  ;;  %1742 = vmatpush1.bf16.msra.mxu1 %v1741_v39  ;;  %v1744_v47 = vpack.c.bf16 %v1876_v40, %v1874_v37 }
 0x1e6   :  { %v1880_v53 = vpop.eup %1879  ;;  %v470_v54 = vrot.slane %v469_v43, 4  ;;  %1743 = vmatprep.subr.bf16.mxu1 %v2020_v15  ;;  %v2239_v12 = vpop.trf.xlu1 }
 0x1e7   :  { %v1882_v55 = vpop.eup %1881  ;;  %v1747_v57 = vpack.c.bf16 %v1880_v53, %v1878_v46 }
 0x1e8   :  { %v471_v59 = vmax.f32 %v469_v43, %v470_v54  ;;  %v1750_v60 = vpack.c.bf16 %v1882_v55, %v1868_v26  ;;  %v40_v54 = vld [vmem:[#allocation3] sm:$0xff]  ;;  %v42_v55 = vld [vmem:[#allocation3 + $0x10] sm:$0xff] }
 0x1e9   :  { %1745 = vmatpush1.bf16.msra.mxu1 %v1744_v47  ;;  %v548_v47 = vld [vmem:[%s2480_s3] sm:$0x3f] }
 0x1ea   :  { %v472_v62 = vrot.slane %v471_v59, 2  ;;  %1746 = vmatprep.subr.bf16.mxu1 %v2020_v15  ;;  %v854_v22 = vpop.trf.xlu1 }
 0x1ec   :  { %v473_v63 = vmax.f32 %v471_v59, %v472_v62  ;;  %v47_v59 = vld [vmem:[#allocation3 + $0x38] sm:$0xff]  ;;  %v46_v62 = vld [vmem:[#allocation3 + $0x30] sm:$0xff] }
 0x1ed   :  { %1748 = vmatpush1.bf16.msra.mxu1 %v1747_v57  ;;  %v1766_v57 = vpack.c.bf16 %v42_v55, %v40_v54 }
 0x1ee   :  { %v474_v2 = vrot.slane %v473_v63, 1  ;;  %1749 = vmatprep.subr.bf16.mxu1 %v2020_v15 }
 0x1f0   :  { %v475_v3 = vmax.f32 %v473_v63, %v474_v2  ;;  %v1770_v63 = vpack.c.bf16 %v46_v62, %v44_v61 }
 0x1f1   :  { %1751 = vmatpush1.bf16.msra.mxu1 %v1750_v60 }
 0x1f2   :  { %v498_v7 = vsub.f32 %v404_v28, %v475_v3  ;;  %1752 = vmatprep.subr.bf16.mxu1 %v2020_v15  ;;  %v492_v9 = vsub.f32 %v2173_v41, %v475_v3  ;;  %v493_v44 = vsub.f32 %v2171_v38, %v475_v3  ;;  %v494_v11 = vsub.f32 %v2187_v56, %v475_v3 }
 0x1f3   :  { %v495_v52 = vsub.f32 %v2179_v50, %v475_v3  ;;  %v496_v48 = vsub.f32 %v2214_v13, %v475_v3  ;;  %v497_v6 = vsub.f32 %v2210_v10, %v475_v3  ;;  %v499_v14 = vsub.f32 %v1689_v25, %v475_v3  ;;  %v1884_v10 = vpop.eup %1883  ;;  %v855_v13 = vpop.trf.xlu1  ;;  %v48_v3 = vld [vmem:[#allocation3 + $0x40] sm:$0xff] }
 0x1f4   :  { %v544_v16 = vmul.f32 1.442695, %v498_v7  ;;  %v532_v18 = vmul.f32 1.442695, %v492_v9  ;;  %v534_v20 = vmul.f32 1.442695, %v493_v44  ;;  %v806_v40 = vmul.f32 %v1884_v10, %v69_v19 }
 0x1f5   :  { %v536_v21 = vmul.f32 1.442695, %v494_v11  ;;  %v538_v41 = vmul.f32 1.442695, %v495_v52  ;;  %v540_v38 = vmul.f32 1.442695, %v496_v48  ;;  %v1774_v7 = vpack.c.bf16 %v50_v5, %v48_v3 }
 0x1f6   :  { %1885 = vpow2.f32 %v544_v16  ;;  %v542_v56 = vmul.f32 1.442695, %v497_v6  ;;  %v546_v50 = vmul.f32 1.442695, %v499_v14  ;;  %v807_v46 = vmul.f32 %v2203_v4, %v806_v40  ;;  %v53_v9 = vld [vmem:[#allocation3 + $0x68] sm:$0xff]  ;;  %v55_v44 = vld [vmem:[#allocation3 + $0x78] sm:$0xff] }
 0x1f7   :  { %1887 = vpow2.f32 %v532_v18  ;;  %v856_v34 = vpop.trf.xlu1  ;;  %v52_v11 = vld [vmem:[#allocation3 + $0x60] sm:$0xff]  ;;  %v1776_v52 = vpack.c.bf16 %v55_v44, %v53_v9  ;;  %v54_v48 = vld [vmem:[#allocation3 + $0x70] sm:$0xff] }
 0x1f8   :  { %1889 = vpow2.f32 %v534_v20  ;;  %v1778_v6 = vpack.c.bf16 %v54_v48, %v52_v11 }
 0x1f9   :  { %1891 = vpow2.f32 %v536_v21 }
 0x1fa   :  { %1893 = vpow2.f32 %v538_v41 }
 0x1fb   :  { %1895 = vpow2.f32 %v540_v38  ;;  %v857_v43 = vpop.trf.xlu1 }
 0x1fc   :  { %1897 = vpow2.f32 %v542_v56 }
 0x1fd   :  { %1899 = vpow2.f32 %v546_v50 }
 0x1ff   :  { %v858_v49 = vpop.trf.xlu1 }
 0x200   :  { %v1886_v24 = vpop.eup %1885 }
 0x201   :  { %v1888_v25 = vpop.eup %1887 }
 0x202   :  { %v1890_v26 = vpop.eup %1889 }
 0x203   :  { %v1892_v27 = vpop.eup %1891  ;;  %v1753_v28 = vpack.c.bf16 %v1890_v26, %v1888_v25  ;;  %v875_v53 = vpop.trf.xlu1 }
 0x204   :  { %v1894_v29 = vpop.eup %1893 }
 0x205   :  { %v1896_v31 = vpop.eup %1895  ;;  %1754 = vmatpush1.bf16.msra.mxu1 %v1753_v28  ;;  %v1756_v32 = vpack.c.bf16 %v1894_v29, %v1892_v27 }
 0x206   :  { %v1898_v35 = vpop.eup %1897  ;;  %1755 = vmatprep.subr.bf16.mxu1 %v2020_v15 }
 0x207   :  { %v1900_v36 = vpop.eup %1899  ;;  %v1759_v37 = vpack.c.bf16 %v1898_v35, %v1896_v31  ;;  %v876_v19 = vpop.trf.xlu1 }
 0x208   :  { %v1762_v39 = vpack.c.bf16 %v1900_v36, %v1886_v24 }
 0x209   :  { %1757 = vmatpush1.bf16.msra.mxu1 %v1756_v32 }
 0x20a   :  { %1758 = vmatprep.subr.bf16.mxu1 %v2020_v15 }
 0x20d   :  { %1760 = vmatpush1.bf16.msra.mxu1 %v1759_v37 }
 0x20e   :  { %1761 = vmatprep.subr.bf16.mxu1 %v2020_v15 }
 0x211   :  { %1763 = vmatpush1.bf16.msra.mxu1 %v1762_v39 }
 0x212   :  { %1690 = vmatprep.subr.mxu1 %v807_v46 }
 0x214   :  { %618 = vmatmul.mubr.f32.vlgmr.msra.gmra.mrb[0].mxu1 %v548_v47 }
 0x215   :  { %1691 = vmatpush3.msra.mxu1 %v807_v46  ;;  %1692 = vmatprep.mubr.msk.f32.mxu1 %vm155_vm1, %v2153_v8  ;;  %v877_v8 = vpop.trf.xlu1 }
 0x218   :  { %1693 = vmatmul.mubr.msk.f32.vlgmr.msra.gmra.mrb[2].mxu1 %vm155_vm1, %v2161_v17 }
 0x219   :  { %1695 = vmatprep.mubr.msk.f32.mxu1 %vm155_vm1, %v2168_v30  ;;  %v878_v17 = vpop.trf.xlu1 }
 0x21c   :  { %1696 = vmatmul.mubr.msk.f32.gmra.mrb[4].mxu1 %vm155_vm1, %v2175_v45 }
 0x21d   :  { %1698 = vmatprep.mubr.msk.f32.mxu1 %vm155_vm1, %v2181_v51  ;;  %v879_v30 = vpop.trf.xlu1 }
 0x220   :  { %1699 = vmatmul.mubr.msk.f32.gmra.mrb[6].mxu1 %vm155_vm1, %v2206_v42  ;;  %v41_v42 = vld [vmem:[#allocation3 + $0x8] sm:$0xff] }
 0x221   :  { %1701 = vmatprep.mubr.msk.f32.mxu1 %vm155_vm1, %v2219_v23  ;;  %v880_v45 = vpop.trf.xlu1  ;;  %v43_v23 = vld [vmem:[#allocation3 + $0x18] sm:$0xff] }
 0x224   :  { %1702 = vmatmul.mubr.msk.f32.gmra.mrb[8].mxu1 %vm155_vm1, %v2223_v33  ;;  %v1764_v33 = vpack.c.bf16 %v43_v23, %v41_v42 }
 0x225   :  { %1704 = vmatprep.mubr.msk.f32.mxu1 %vm155_vm1, %v2226_v58  ;;  %v881_v51 = vpop.trf.xlu1  ;;  %v45_v58 = vld [vmem:[#allocation3 + $0x28] sm:$0xff] }
 0x226   :  { %1765 = vmatprep.subr.bf16.mxu0 %v1764_v33  ;;  %1817 = vmatprep.subr.bf16.mxu1 %v1764_v33  ;;  %v1768_v60 = vpack.c.bf16 %v47_v59, %v45_v58 }
 0x227   :  { %1767 = vmatpush1.bf16.msra.mxu0 %v1766_v57  ;;  %1819 = vmatpush1.bf16.msra.mxu1 %v1766_v57 }
 0x228   :  { %1705 = vmatmul.mubr.msk.f32.gmra.mrb[10].mxu1 %vm155_vm1, %v2229_v0  ;;  %1769 = vmatprep.subr.bf16.mxu0 %v1768_v60  ;;  %v49_v0 = vld [vmem:[#allocation3 + $0x48] sm:$0xff] }
 0x229   :  { %1707 = vmatprep.mubr.msk.f32.mxu1 %vm155_vm1, %v2239_v12  ;;  %v882_v4 = vpop.trf.xlu1  ;;  %1821 = vmatprep.subr.bf16.mxu1 %v1768_v60  ;;  %v1772_v2 = vpack.c.bf16 %v51_v1, %v49_v0  ;;  %v2021_v12 = vmov 0.0  }
 0x22a   :  { %695 = vmatprep.mubr.f32.mxu0 %v2021_v12 }
 0x22b   :  { %1771 = vmatpush1.bf16.msra.mxu0 %v1770_v63  ;;  %1823 = vmatpush1.bf16.msra.mxu1 %v1770_v63 }
 0x22c   :  { %1708 = vmatmul.mubr.msk.f32.gmra.mrb[12].mxu1 %vm155_vm1, %v854_v22  ;;  %1773 = vmatprep.subr.bf16.mxu0 %v1772_v2 }
 0x22d   :  { %1710 = vmatprep.mubr.msk.f32.mxu1 %vm155_vm1, %v855_v13  ;;  %1825 = vmatprep.subr.bf16.mxu1 %v1772_v2 }
 0x22f   :  { %1775 = vmatpush1.bf16.msra.mxu0 %v1774_v7  ;;  %1827 = vmatpush1.bf16.msra.mxu1 %v1774_v7 }
 0x230   :  { %1711 = vmatmul.mubr.msk.f32.gmra.mrb[14].mxu1 %vm155_vm1, %v856_v34  ;;  %1777 = vmatprep.subr.bf16.mxu0 %v1776_v52  ;;  %v1596_v34 = vld [vmem:[%s2480_s3 + $0x18] sm:$0x3f] }
 0x231   :  { %1713 = vmatprep.mubr.msk.f32.mxu1 %vm155_vm1, %v857_v43  ;;  %1829 = vmatprep.subr.bf16.mxu1 %v1776_v52 }
 0x233   :  { %1779 = vmatpush1.bf16.msra.mxu0 %v1778_v6  ;;  %1831 = vmatpush1.bf16.msra.mxu1 %v1778_v6 }
 0x234   :  { %1714 = vmatmul.mubr.msk.f32.gmra.mrb[16].mxu1 %vm155_vm1, %v858_v49  ;;  %1780 = vmatprep.subr.bf16.mxu0 %v2020_v15 }
 0x235   :  { %1716 = vmatprep.mubr.msk.f32.mxu1 %vm155_vm1, %v875_v53 }
 0x238   :  { %1717 = vmatmul.mubr.msk.f32.gmra.mrb[18].mxu1 %vm155_vm1, %v876_v19 }
 0x239   :  { %1719 = vmatprep.mubr.msk.f32.mxu1 %vm155_vm1, %v877_v8 }
 0x23c   :  { %1720 = vmatmul.mubr.msk.f32.gmra.mrb[20].mxu1 %vm155_vm1, %v878_v17 }
 0x23d   :  { %1722 = vmatprep.mubr.msk.f32.mxu1 %vm155_vm1, %v879_v30 }
 0x240   :  { %1723 = vmatmul.mubr.msk.f32.gmra.mrb[22].mxu1 %vm155_vm1, %v880_v45 }
 0x241   :  { %1725 = vmatprep.mubr.msk.f32.mxu1 %vm155_vm1, %v881_v51 }
 0x244   :  { %1726 = vmatmul.mubr.msk.f32.gmra.mrb[24].mxu1 %vm155_vm1, %v882_v4 }
 0x245   :  { %1431 = vmatprep.mubr.f32.mxu1 %v2021_v12 }
 0x2e7   :  { %v619_v14 = vpop.f32.mrb[0].mxu1 }
 0x2e8   :  { %v624_v16 = vrot.slane %v619_v14, 3  ;;  %v621_v18 = vpop.f32.mrb[1].mxu1 }
 0x2ea   :  { %1901 = vrcp.f32 %v624_v16 }
 0x2eb   :  { %v2288_v20 = vpop.f32.mrb[2].mxu1 }
 0x2ec   :  { %v2290_v21 = vpop.f32.mrb[3].mxu1  ;;  %v1149_v38 = vsel %vm60_vm0, %v2288_v20, -inf }
 0x2ed   :  { %v1148_v22 = vsel %vm60_vm0, %v2290_v21, -inf }
 0x2ef   :  { %v2292_v41 = vpop.f32.mrb[4].mxu1 }
 0x2f0   :  { %v1152_v56 = vsel %vm60_vm0, %v2292_v41, -inf  ;;  %v2298_v50 = vpop.f32.mrb[5].mxu1 }
 0x2f1   :  { %v1153_v10 = vmax.f32 %v1149_v38, %v1152_v56  ;;  %v1150_v13 = vsel %vm60_vm0, %v2298_v50, -inf }
 0x2f2   :  { %v1151_v24 = vmax.f32 %v1148_v22, %v1150_v13 }
 0x2f3   :  { %v2304_v25 = vpop.f32.mrb[6].mxu1 }
 0x2f4   :  { %v1902_v26 = vpop.eup %1901  ;;  %v1156_v27 = vsel %vm60_vm0, %v2304_v25, -inf  ;;  %v2308_v28 = vpop.f32.mrb[7].mxu1 }
 0x2f5   :  { %v627_v29 = vmul.f32 %v1902_v26, %v619_v14  ;;  %v1157_v31 = vmax.f32 %v1153_v10, %v1156_v27  ;;  %v1154_v32 = vsel %vm60_vm0, %v2308_v28, -inf }
 0x2f6   :  { %v1155_v35 = vmax.f32 %v1151_v24, %v1154_v32 }
 0x2f7   :  { %1565 = vmatmul.mubr.msk.f32.vlgmr.msra.gmra.mrb[24].mxu0 %vm60_vm0, %v627_v29  ;;  %v2316_v36 = vpop.f32.mrb[8].mxu1 }
 0x2f8   :  { %v1160_v37 = vsel %vm60_vm0, %v2316_v36, -inf  ;;  %v1059_v39 = vpop.f32.mrb[9].mxu1  ;;  %1597 = vmatprep.mubr.msk.f32.mxu0 %vm60_vm0, %v1596_v34 }
 0x2f9   :  { %v1161_v40 = vmax.f32 %v1157_v31, %v1160_v37  ;;  %v1158_v43 = vsel %vm60_vm0, %v1059_v39, -inf }
 0x2fa   :  { %v1159_v46 = vmax.f32 %v1155_v35, %v1158_v43 }
 0x2fb   :  { %v2322_v47 = vpop.f32.mrb[10].mxu1 }
 0x2fc   :  { %v1162_v49 = vmax.f32 %v1159_v46, %v1161_v40  ;;  %v2324_v53 = vpop.f32.mrb[11].mxu1  ;;  %v1170_v30 = vsel %vm60_vm0, %v2322_v47, -inf }
 0x2fd   :  { %v1169_v4 = vsel %vm60_vm0, %v2324_v53, -inf }
 0x2fe   :  { %v1163_v19 = vrot.slane %v1162_v49, 4 }
 0x2ff   :  { %v2326_v8 = vpop.f32.mrb[12].mxu1 }
 0x300   :  { %v1164_v17 = vmax.f32 %v1162_v49, %v1163_v19  ;;  %v1173_v45 = vsel %vm60_vm0, %v2326_v8, -inf  ;;  %v2332_v51 = vpop.f32.mrb[13].mxu1 }
 0x301   :  { %v1174_v42 = vmax.f32 %v1170_v30, %v1173_v45  ;;  %v1171_v23 = vsel %vm60_vm0, %v2332_v51, -inf }
 0x302   :  { %v1165_v33 = vrot.slane %v1164_v17, 2  ;;  %v1172_v54 = vmax.f32 %v1169_v4, %v1171_v23 }
 0x303   :  { %v2338_v55 = vpop.f32.mrb[14].mxu1 }
 0x304   :  { %v1166_v57 = vmax.f32 %v1164_v17, %v1165_v33  ;;  %v1177_v58 = vsel %vm60_vm0, %v2338_v55, -inf  ;;  %v2342_v59 = vpop.f32.mrb[15].mxu1 }
 0x305   :  { %v1178_v60 = vmax.f32 %v1174_v42, %v1177_v58  ;;  %v1175_v61 = vsel %vm60_vm0, %v2342_v59, -inf }
 0x306   :  { %v1167_v62 = vrot.slane %v1166_v57, 1  ;;  %v1176_v63 = vmax.f32 %v1172_v54, %v1175_v61 }
 0x307   :  { %v2346_v0 = vpop.f32.mrb[16].mxu1 }
 0x308   :  { %v1168_v1 = vmax.f32 %v1166_v57, %v1167_v62  ;;  %v1181_v2 = vsel %vm60_vm0, %v2346_v0, -inf  ;;  %v2350_v3 = vpop.f32.mrb[17].mxu1 }
 0x309   :  { %v1182_v5 = vmax.f32 %v1178_v60, %v1181_v2  ;;  %v1179_v7 = vsel %vm60_vm0, %v2350_v3, -inf }
 0x30a   :  { %v1217_v9 = vsub.f32 %v1059_v39, %v1168_v1  ;;  %v1180_v44 = vmax.f32 %v1176_v63, %v1179_v7  ;;  %v1211_v11 = vsub.f32 %v2290_v21, %v1168_v1  ;;  %v1212_v52 = vsub.f32 %v2288_v20, %v1168_v1 }
 0x30b   :  { %v2356_v48 = vpop.f32.mrb[18].mxu1  ;;  %v1213_v6 = vsub.f32 %v2298_v50, %v1168_v1  ;;  %v1214_v12 = vsub.f32 %v2292_v41, %v1168_v1  ;;  %v1215_v14 = vsub.f32 %v2308_v28, %v1168_v1  ;;  %v1216_v16 = vsub.f32 %v2304_v25, %v1168_v1 }
 0x30c   :  { %v1247_v18 = vmul.f32 1.442695, %v1217_v9  ;;  %v1183_v38 = vmax.f32 %v1180_v44, %v1182_v5  ;;  %v2362_v56 = vpop.f32.mrb[19].mxu1  ;;  %v1235_v22 = vmul.f32 1.442695, %v1211_v11  ;;  %v1218_v21 = vsub.f32 %v2316_v36, %v1168_v1 }
 0x30d   :  { %v1237_v10 = vmul.f32 1.442695, %v1212_v52  ;;  %v1239_v13 = vmul.f32 1.442695, %v1213_v6  ;;  %v1241_v24 = vmul.f32 1.442695, %v1214_v12 }
 0x30e   :  { %1903 = vpow2.f32 %v1247_v18  ;;  %v1184_v20 = vrot.slane %v1183_v38, 4  ;;  %v1191_v50 = vsel %vm60_vm0, %v2356_v48, -inf  ;;  %v1190_v41 = vsel %vm60_vm0, %v2362_v56, -inf }
 0x30f   :  { %v2369_v26 = vpop.f32.mrb[20].mxu1  ;;  %1905 = vpow2.f32 %v1235_v22  ;;  %v1243_v25 = vmul.f32 1.442695, %v1215_v14  ;;  %v1245_v31 = vmul.f32 1.442695, %v1216_v16 }
 0x310   :  { %v1185_v27 = vmax.f32 %v1183_v38, %v1184_v20  ;;  %v1194_v28 = vsel %vm60_vm0, %v2369_v26, -inf  ;;  %v2373_v29 = vpop.f32.mrb[21].mxu1  ;;  %1907 = vpow2.f32 %v1237_v10  ;;  %v1249_v35 = vmul.f32 1.442695, %v1218_v21 }
 0x311   :  { %v1195_v32 = vmax.f32 %v1191_v50, %v1194_v28  ;;  %v1192_v34 = vsel %vm60_vm0, %v2373_v29, -inf  ;;  %1909 = vpow2.f32 %v1239_v13 }
 0x312   :  { %v1186_v36 = vrot.slane %v1185_v27, 2  ;;  %v1193_v37 = vmax.f32 %v1190_v41, %v1192_v34  ;;  %1911 = vpow2.f32 %v1241_v24 }
 0x313   :  { %v2377_v39 = vpop.f32.mrb[22].mxu1  ;;  %1913 = vpow2.f32 %v1243_v25 }
 0x314   :  { %v1187_v40 = vmax.f32 %v1185_v27, %v1186_v36  ;;  %v1198_v43 = vsel %vm60_vm0, %v2377_v39, -inf  ;;  %v2381_v46 = vpop.f32.mrb[23].mxu1  ;;  %1915 = vpow2.f32 %v1245_v31 }
 0x315   :  { %v1199_v49 = vmax.f32 %v1195_v32, %v1198_v43  ;;  %v1196_v19 = vsel %vm60_vm0, %v2381_v46, -inf  ;;  %1917 = vpow2.f32 %v1249_v35 }
 0x316   :  { %v1188_v17 = vrot.slane %v1187_v40, 1  ;;  %v1197_v30 = vmax.f32 %v1193_v37, %v1196_v19 }
 0x317   :  { %v2385_v45 = vpop.f32.mrb[24].mxu1 }
 0x318   :  { %v1904_v4 = vpop.eup %1903  ;;  %v1189_v42 = vmax.f32 %v1187_v40, %v1188_v17  ;;  %v1202_v23 = vsel %vm60_vm0, %v2385_v45, -inf  ;;  %v2389_v33 = vpop.f32.mrb[25].mxu1 }
 0x319   :  { %v1906_v54 = vpop.eup %1905  ;;  %v1203_v57 = vmax.f32 %v1199_v49, %v1202_v23  ;;  %v1200_v58 = vsel %vm60_vm0, %v2389_v33, -inf }
 0x31a   :  { %v1908_v60 = vpop.eup %1907  ;;  %v1225_v61 = vsub.f32 %v2350_v3, %v1189_v42  ;;  %v1201_v62 = vmax.f32 %v1197_v30, %v1200_v58  ;;  %v1219_v63 = vsub.f32 %v2324_v53, %v1189_v42  ;;  %v1220_v1 = vsub.f32 %v2322_v47, %v1189_v42 }
 0x31b   :  { %v1910_v2 = vpop.eup %1909  ;;  %v1781_v5 = vpack.c.bf16 %v1908_v60, %v1906_v54  ;;  %v1221_v7 = vsub.f32 %v2332_v51, %v1189_v42  ;;  %v1222_v9 = vsub.f32 %v2326_v8, %v1189_v42  ;;  %v1223_v44 = vsub.f32 %v2342_v59, %v1189_v42 }
 0x31c   :  { %v1912_v11 = vpop.eup %1911  ;;  %v1263_v52 = vmul.f32 1.442695, %v1225_v61  ;;  %v1204_v6 = vmax.f32 %v1201_v62, %v1203_v57  ;;  %v1251_v12 = vmul.f32 1.442695, %v1219_v63  ;;  %v1253_v14 = vmul.f32 1.442695, %v1220_v1 }
 0x31d   :  { %v1914_v16 = vpop.eup %1913  ;;  %1782 = vmatpush1.bf16.msra.mxu0 %v1781_v5  ;;  %v1784_v3 = vpack.c.bf16 %v1912_v11, %v1910_v2  ;;  %v1255_v18 = vmul.f32 1.442695, %v1221_v7  ;;  %v1224_v53 = vsub.f32 %v2338_v55, %v1189_v42  ;;  %v1257_v51 = vmul.f32 1.442695, %v1222_v9 }
 0x31e   :  { %v1916_v47 = vpop.eup %1915  ;;  %1919 = vpow2.f32 %v1263_v52  ;;  %v1205_v38 = vrot.slane %v1204_v6, 4  ;;  %1783 = vmatprep.subr.bf16.mxu0 %v2020_v15  ;;  %v1226_v8 = vsub.f32 %v2346_v0, %v1189_v42  ;;  %v1259_v10 = vmul.f32 1.442695, %v1223_v44  ;;  %v1595_v52 = vld [vmem:[%s2480_s3 + $0x10] sm:$0x3f] }
 0x31f   :  { %v1918_v59 = vpop.eup %1917  ;;  %v1787_v22 = vpack.c.bf16 %v1916_v47, %v1914_v16  ;;  %1921 = vpow2.f32 %v1251_v12  ;;  %v1261_v20 = vmul.f32 1.442695, %v1224_v53 }
 0x320   :  { %v1206_v13 = vmax.f32 %v1204_v6, %v1205_v38  ;;  %v1790_v21 = vpack.c.bf16 %v1918_v59, %v1904_v4  ;;  %1923 = vpow2.f32 %v1253_v14  ;;  %v1265_v24 = vmul.f32 1.442695, %v1226_v8 }
 0x321   :  { %1785 = vmatpush1.bf16.msra.mxu0 %v1784_v3  ;;  %1925 = vpow2.f32 %v1255_v18 }
 0x322   :  { %v1207_v55 = vrot.slane %v1206_v13, 2  ;;  %1786 = vmatprep.subr.bf16.mxu0 %v2020_v15  ;;  %1927 = vpow2.f32 %v1257_v51 }
 0x323   :  { %1929 = vpow2.f32 %v1259_v10 }
 0x324   :  { %v1208_v50 = vmax.f32 %v1206_v13, %v1207_v55  ;;  %1931 = vpow2.f32 %v1261_v20 }
 0x325   :  { %1788 = vmatpush1.bf16.msra.mxu0 %v1787_v22  ;;  %1933 = vpow2.f32 %v1265_v24 }
 0x326   :  { %v1209_v0 = vrot.slane %v1208_v50, 1  ;;  %1789 = vmatprep.subr.bf16.mxu0 %v2020_v15 }
 0x328   :  { %v1920_v41 = vpop.eup %1919  ;;  %v1210_v25 = vmax.f32 %v1208_v50, %v1209_v0 }
 0x329   :  { %v1922_v27 = vpop.eup %1921  ;;  %1791 = vmatpush1.bf16.msra.mxu0 %v1790_v21 }
 0x32a   :  { %v1924_v28 = vpop.eup %1923  ;;  %v1233_v31 = vsub.f32 %v2389_v33, %v1210_v25  ;;  %1792 = vmatprep.subr.bf16.mxu0 %v2020_v15  ;;  %v1227_v32 = vsub.f32 %v2362_v56, %v1210_v25  ;;  %v1228_v34 = vsub.f32 %v2356_v48, %v1210_v25  ;;  %v1229_v35 = vsub.f32 %v2373_v29, %v1210_v25 }
 0x32b   :  { %v1926_v36 = vpop.eup %1925  ;;  %v1793_v37 = vpack.c.bf16 %v1924_v28, %v1922_v27  ;;  %v1230_v40 = vsub.f32 %v2369_v26, %v1210_v25  ;;  %v1231_v43 = vsub.f32 %v2381_v46, %v1210_v25  ;;  %v1232_v49 = vsub.f32 %v2377_v39, %v1210_v25 }
 0x32c   :  { %v1928_v19 = vpop.eup %1927  ;;  %v1279_v17 = vmul.f32 1.442695, %v1233_v31  ;;  %v1267_v30 = vmul.f32 1.442695, %v1227_v32  ;;  %v1269_v4 = vmul.f32 1.442695, %v1228_v34  ;;  %v1234_v42 = vsub.f32 %v2385_v45, %v1210_v25 }
 0x32d   :  { %v1930_v23 = vpop.eup %1929  ;;  %1794 = vmatpush1.bf16.msra.mxu0 %v1793_v37  ;;  %v1796_v56 = vpack.c.bf16 %v1928_v19, %v1926_v36  ;;  %v1271_v48 = vmul.f32 1.442695, %v1229_v35  ;;  %v1273_v29 = vmul.f32 1.442695, %v1230_v40  ;;  %v1275_v46 = vmul.f32 1.442695, %v1231_v43 }
 0x32e   :  { %v1932_v33 = vpop.eup %1931  ;;  %1935 = vpow2.f32 %v1279_v17  ;;  %1795 = vmatprep.subr.bf16.mxu0 %v2020_v15  ;;  %v1277_v57 = vmul.f32 1.442695, %v1232_v49  ;;  %v1281_v58 = vmul.f32 1.442695, %v1234_v42 }
 0x32f   :  { %v1934_v26 = vpop.eup %1933  ;;  %v1799_v54 = vpack.c.bf16 %v1932_v33, %v1930_v23  ;;  %1937 = vpow2.f32 %v1267_v30 }
 0x330   :  { %v1802_v39 = vpack.c.bf16 %v1934_v26, %v1920_v41  ;;  %1939 = vpow2.f32 %v1269_v4  ;;  %v757_v26 = vlaneseq }
 0x331   :  { %1797 = vmatpush1.bf16.msra.mxu0 %v1796_v56  ;;  %1941 = vpow2.f32 %v1271_v48 }
 0x332   :  { %1798 = vmatprep.subr.bf16.mxu0 %v2020_v15  ;;  %1943 = vpow2.f32 %v1273_v29  ;;  %vm2442_vm3 = vcmp.lt.s32.totalorder %v757_v26, 256 }
 0x333   :  { %1945 = vpow2.f32 %v1275_v46 }
 0x334   :  { %1947 = vpow2.f32 %v1277_v57  ;;  %v2427_v57 = vshrl.u32 %v757_v26, 7 }
 0x335   :  { %1800 = vmatpush1.bf16.msra.mxu0 %v1799_v54  ;;  %1949 = vpow2.f32 %v1281_v58 }
 0x336   :  { %1801 = vmatprep.subr.bf16.mxu0 %v2020_v15  ;;  %v759_v58 = vsub.s32 0, %v2427_v57 }
 0x338   :  { %v1936_v45 = vpop.eup %1935 }
 0x339   :  { %v1938_v60 = vpop.eup %1937  ;;  %1803 = vmatpush1.bf16.msra.mxu0 %v1802_v39 }
 0x33a   :  { %v1940_v61 = vpop.eup %1939  ;;  %1804 = vmatprep.subr.bf16.mxu0 %v2020_v15 }
 0x33b   :  { %v1942_v62 = vpop.eup %1941  ;;  %v1805_v63 = vpack.c.bf16 %v1940_v61, %v1938_v60  ;;  %v763_v60 = vsub.s32 1, %v2427_v57  ;;  %v2022_v61 = vmov 1966171168  }
 0x33c   :  { %v1944_v1 = vpop.eup %1943 }
 0x33d   :  { %v1946_v2 = vpop.eup %1945  ;;  %1806 = vmatpush1.bf16.msra.mxu0 %v1805_v63  ;;  %v1808_v5 = vpack.c.bf16 %v1944_v1, %v1942_v62  ;;  %v773_v62 = vunpack.c.l.s4 %v2022_v61 }
 0x33e   :  { %v1948_v7 = vpop.eup %1947  ;;  %1807 = vmatprep.subr.bf16.mxu0 %v2020_v15 }
 0x33f   :  { %v1950_v9 = vpop.eup %1949  ;;  %v1811_v44 = vpack.c.bf16 %v1948_v7, %v1946_v2 }
 0x340   :  { %v1814_v11 = vpack.c.bf16 %v1950_v9, %v1936_v45  ;;  %v755_v45 = vld [vmem:[%s2482_s5] sm:$0x3] }
 0x341   :  { %1809 = vmatpush1.bf16.msra.mxu0 %v1808_v5  ;;  %v760_v63 = vrot.slane %v755_v45, %v759_v58  ;;  %v764_v2 = vrot.slane %v755_v45, %v763_v60  ;;  %v774_v5 = vunpack.c.0.s8 %v773_v62 }
 0x342   :  { %1810 = vmatprep.subr.bf16.mxu0 %v2020_v15 }
 0x345   :  { %1812 = vmatpush1.bf16.msra.mxu0 %v1811_v44 }
 0x346   :  { %1813 = vmatprep.subr.bf16.mxu0 %v2020_v15 }
 0x349   :  { %1815 = vmatpush1.bf16.msra.mxu0 %v1814_v11 }
 0x34c   :  { %1354 = vmatmul.mubr.f32.vlgmr.msra.gmra.mrb[26].mxu0 %v1595_v52 }
 0x3ca   :  { %v697_v6 = vpop.f32.mrb[24].mxu0 }
 0x3cb   :  { %v703_v12 = vsel %vm702_vm2, %v697_v6, 0.0  ;;  %v699_v14 = vpop.f32.mrb[25].mxu0 }
 0x3cc   :  { %v704_v16 = vrot.slane %v703_v12, 4  ;;  %v710_v3 = vsel %vm702_vm2, %v699_v14, 0.0 }
 0x3cd   :  { %v711_v18 = vrot.slane %v710_v3, 4 }
 0x3ce   :  { %v705_v53 = vadd.f32 %v704_v16, %v703_v12 }
 0x3cf   :  { %v712_v47 = vadd.f32 %v711_v18, %v710_v3 }
 0x3d0   :  { %v706_v38 = vrot.slane %v705_v53, 2 }
 0x3d1   :  { %v713_v51 = vrot.slane %v712_v47, 2 }
 0x3d2   :  { %v707_v15 = vadd.f32 %v706_v38, %v705_v53 }
 0x3d3   :  { %v714_v8 = vadd.f32 %v713_v51, %v712_v47 }
 0x3d4   :  { %v708_v59 = vrot.slane %v707_v15, 1 }
 0x3d5   :  { %v715_v22 = vrot.slane %v714_v8, 1 }
 0x3d6   :  { %v709_v10 = vadd.f32 %v708_v59, %v707_v15 }
 0x3d7   :  { %v716_v13 = vadd.f32 %v715_v22, %v714_v8 }
 0x3d8   :  { %v718_v21 = vmul.f32 0.33333334, %v709_v10 }
 0x3d9   :  { %v719_v20 = vmul.f32 0.33333334, %v716_v13 }
 0x3da   :  { %v720_v24 = vsub.f32 %v697_v6, %v718_v21  ;;  %v2439_v6 = vsub.s32 %v774_v5, %v2427_v57 }
 0x3db   :  { %v721_v55 = vsub.f32 %v699_v14, %v719_v20 }
 0x3dc   :  { %v722_v50 = vmul.f32 %v720_v24, %v720_v24 }
 0x3dd   :  { %v723_v0 = vmul.f32 %v721_v55, %v721_v55 }
 0x3de   :  { %v724_v41 = vsel %vm702_vm2, %v722_v50, 0.0 }
 0x3df   :  { %v725_v25 = vrot.slane %v724_v41, 4  ;;  %v731_v27 = vsel %vm702_vm2, %v723_v0, 0.0 }
 0x3e0   :  { %v732_v28 = vrot.slane %v731_v27, 4 }
 0x3e1   :  { %v726_v31 = vadd.f32 %v725_v25, %v724_v41 }
 0x3e2   :  { %v733_v32 = vadd.f32 %v732_v28, %v731_v27 }
 0x3e3   :  { %v727_v34 = vrot.slane %v726_v31, 2 }
 0x3e4   :  { %v734_v35 = vrot.slane %v733_v32, 2 }
 0x3e5   :  { %v728_v36 = vadd.f32 %v727_v34, %v726_v31 }
 0x3e6   :  { %v735_v37 = vadd.f32 %v734_v35, %v733_v32 }
 0x3e7   :  { %v729_v40 = vrot.slane %v728_v36, 1 }
 0x3e8   :  { %v736_v43 = vrot.slane %v735_v37, 1 }
 0x3e9   :  { %v730_v49 = vadd.f32 %v729_v40, %v728_v36 }
 0x3ea   :  { %v737_v19 = vadd.f32 %v736_v43, %v735_v37 }
 0x3eb   :  { %v739_v17 = vmul.f32 0.5, %v730_v49 }
 0x3ec   :  { %v740_v30 = vmul.f32 0.5, %v737_v19 }
 0x3ed   :  { %v741_v4 = vadd.f32 1.0, %v739_v17 }
 0x3ee   :  { %v742_v42 = vadd.f32 1.0, %v740_v30 }
 0x3ef   :  { %1951 = vrcp.f32 %v741_v4 }
 0x3f0   :  { %1953 = vrcp.f32 %v742_v42 }
 0x3f9   :  { %v1952_v23 = vpop.eup %1951 }
 0x3fa   :  { %v1954_v56 = vpop.eup %1953  ;;  %v744_v48 = vmul.f32 20.0, %v1952_v23 }
 0x3fb   :  { %v746_v33 = vmul.f32 20.0, %v1954_v56 }
 0x3fc   :  { %v1566_v29 = vadd.f32 -20.0, %v744_v48 }
 0x3fd   :  { %v1567_v54 = vadd.f32 -20.0, %v746_v33 }
 0x3fe   :  { %v749_v46 = vmul.f32 1.442695, %v1566_v29 }
 0x3ff   :  { %v751_v39 = vmul.f32 1.442695, %v1567_v54 }
 0x400   :  { %1955 = vpow2.f32 %v749_v46 }
 0x401   :  { %1957 = vpow2.f32 %v751_v39 }
 0x40a   :  { %v1956_v1 = vpop.eup %1955 }
 0x40b   :  { %v1958_v7 = vpop.eup %1957  ;;  %v753_v9 = vmul.f32 %v1956_v1, %v718_v21 }
 0x40c   :  { %v754_v44 = vmul.f32 %v1958_v7, %v719_v20 }
 0x40d   :  { %v767_v11 = vadd.f32 %v760_v63, %v753_v9 }
 0x40e   :  { %v768_v52 = vadd.f32 %v764_v2, %v754_v44  ;;  %v1601_v44 = vld [vmem:[%s2482_s5 + $0x2] sm:$0x3]  ;;  %s1991_s5 = scalar_lea.vmem %s1529_s13, 64 }
 0x40f   :  { %p1992_p8 = scmp.ne.s32.totalorder %s1529_s13, %s1991_s5  ;;  %p1997_p10 = scmp.lt.s32.totalorder %s1991_s5, %s1991_s5 }
 0x410   :  { %v771_v12 = vcombine.low %v767_v11, %v768_v52  ;;  %v1494_v11 = vrot.slane %v1601_v44, %v759_v58 }
 0x411   :  { %p1998_p11 = por %p1997_p10, %p1996_p9 }
 0x412   :  { %v778_v14 = vrot.slane %v771_v12, %v2439_v6  ;;  %v1498_v12 = vrot.slane %v1601_v44, %v763_v60 }
 0x413   :  { %p1999_p12 = pnand %p1998_p11, %p1992_p8 }
 0x414   :  { %v785_v3 = vrot.slane %v778_v14, %v2439_v6 }
 0x416   :  { %791 = vst.msk [vmem:[#allocation6] sm:$0x3] %vm2442_vm3, %v785_v3 }
 0x41f   :  { %v1355_v18 = vpop.f32.mrb[26].mxu0 }
 0x420   :  { %v1360_v53 = vrot.slane %v1355_v18, 3  ;;  %v1357_v47 = vpop.f32.mrb[27].mxu0 }
 0x422   :  { %1959 = vrcp.f32 %v1360_v53 }
 0x42c   :  { %v1960_v38 = vpop.eup %1959 }
 0x42d   :  { %v1363_v51 = vmul.f32 %v1960_v38, %v1355_v18 }
 0x42f   :  { %1598 = vmatmul.mubr.msk.f32.vlgmr.msra.gmra.mrb[26].mxu1 %vm60_vm0, %v1363_v51 }
 0x502   :  { %v1433_v15 = vpop.f32.mrb[26].mxu1 }
 0x503   :  { %v1438_v8 = vsel %vm702_vm2, %v1433_v15, 0.0  ;;  %v1435_v59 = vpop.f32.mrb[27].mxu1 }
 0x504   :  { %v1439_v22 = vrot.slane %v1438_v8, 4  ;;  %v1445_v10 = vsel %vm702_vm2, %v1435_v59, 0.0 }
 0x505   :  { %v1446_v13 = vrot.slane %v1445_v10, 4 }
 0x506   :  { %v1440_v21 = vadd.f32 %v1439_v22, %v1438_v8 }
 0x507   :  { %v1447_v20 = vadd.f32 %v1446_v13, %v1445_v10 }
 0x508   :  { %v1441_v24 = vrot.slane %v1440_v21, 2 }
 0x509   :  { %v1448_v55 = vrot.slane %v1447_v20, 2 }
 0x50a   :  { %v1442_v50 = vadd.f32 %v1441_v24, %v1440_v21 }
 0x50b   :  { %v1449_v0 = vadd.f32 %v1448_v55, %v1447_v20 }
 0x50c   :  { %v1443_v41 = vrot.slane %v1442_v50, 1 }
 0x50d   :  { %v1450_v25 = vrot.slane %v1449_v0, 1 }
 0x50e   :  { %v1444_v27 = vadd.f32 %v1443_v41, %v1442_v50 }
 0x50f   :  { %v1451_v28 = vadd.f32 %v1450_v25, %v1449_v0 }
 0x510   :  { %v1452_v31 = vmul.f32 0.33333334, %v1444_v27 }
 0x511   :  { %v1453_v32 = vmul.f32 0.33333334, %v1451_v28 }
 0x512   :  { %v1454_v34 = vsub.f32 %v1433_v15, %v1452_v31 }
 0x513   :  { %v1455_v35 = vsub.f32 %v1435_v59, %v1453_v32 }
 0x514   :  { %v1456_v36 = vmul.f32 %v1454_v34, %v1454_v34 }
 0x515   :  { %v1457_v37 = vmul.f32 %v1455_v35, %v1455_v35 }
 0x516   :  { %v1458_v40 = vsel %vm702_vm2, %v1456_v36, 0.0 }
 0x517   :  { %v1459_v43 = vrot.slane %v1458_v40, 4  ;;  %v1465_v49 = vsel %vm702_vm2, %v1457_v37, 0.0 }
 0x518   :  { %v1466_v19 = vrot.slane %v1465_v49, 4 }
 0x519   :  { %v1460_v17 = vadd.f32 %v1459_v43, %v1458_v40 }
 0x51a   :  { %v1467_v30 = vadd.f32 %v1466_v19, %v1465_v49 }
 0x51b   :  { %v1461_v4 = vrot.slane %v1460_v17, 2 }
 0x51c   :  { %v1468_v42 = vrot.slane %v1467_v30, 2 }
 0x51d   :  { %v1462_v23 = vadd.f32 %v1461_v4, %v1460_v17 }
 0x51e   :  { %v1469_v56 = vadd.f32 %v1468_v42, %v1467_v30 }
 0x51f   :  { %v1463_v48 = vrot.slane %v1462_v23, 1 }
 0x520   :  { %v1470_v33 = vrot.slane %v1469_v56, 1 }
 0x521   :  { %v1464_v29 = vadd.f32 %v1463_v48, %v1462_v23 }
 0x522   :  { %v1471_v26 = vadd.f32 %v1470_v33, %v1469_v56 }
 0x523   :  { %v1472_v54 = vmul.f32 0.5, %v1464_v29 }
 0x524   :  { %v1473_v46 = vmul.f32 0.5, %v1471_v26 }
 0x525   :  { %v1474_v39 = vadd.f32 1.0, %v1472_v54 }
 0x526   :  { %v1475_v45 = vadd.f32 1.0, %v1473_v46 }
 0x527   :  { %1961 = vrcp.f32 %v1474_v39 }
 0x528   :  { %1963 = vrcp.f32 %v1475_v45 }
 0x531   :  { %v1962_v61 = vpop.eup %1961 }
 0x532   :  { %v1964_v62 = vpop.eup %1963  ;;  %v1477_v63 = vmul.f32 20.0, %v1962_v61 }
 0x533   :  { %v1479_v1 = vmul.f32 20.0, %v1964_v62 }
 0x534   :  { %v1599_v2 = vadd.f32 -20.0, %v1477_v63 }
 0x535   :  { %v1600_v5 = vadd.f32 -20.0, %v1479_v1 }
 0x536   :  { %v1482_v7 = vmul.f32 1.442695, %v1599_v2 }
 0x537   :  { %v1484_v9 = vmul.f32 1.442695, %v1600_v5 }
 0x538   :  { %1965 = vpow2.f32 %v1482_v7 }
 0x539   :  { %1967 = vpow2.f32 %v1484_v9 }
 0x542   :  { %v1966_v52 = vpop.eup %1965 }
 0x543   :  { %v1968_v14 = vpop.eup %1967  ;;  %v1486_v3 = vmul.f32 %v1966_v52, %v1452_v31 }
 0x544   :  { %v1487_v18 = vmul.f32 %v1968_v14, %v1453_v32 }
 0x545   :  { %v1501_v53 = vadd.f32 %v1494_v11, %v1486_v3 }
 0x546   :  { %v1502_v47 = vadd.f32 %v1498_v12, %v1487_v18 }
 0x548   :  { %v1505_v38 = vcombine.low %v1501_v53, %v1502_v47 }
 0x54a   :  { %v1512_v51 = vrot.slane %v1505_v38, %v2439_v6 }
 0x54c   :  { %v1519_v15 = vrot.slane %v1512_v51, %v2439_v6 }
 0x54e   :  { %1522 = vst.msk [vmem:[#allocation6 + $0x2] sm:$0x3] %vm2442_vm3, %v1519_v15 }
 0x54f   :  { %2002 = shalt.err (!%p1999_p12)
}
 0x550   :  { %s2003_s15 = scalar_lea.hbm %s2483_s6, 64 }
 0x551   :  { %p2004_p13 = scmp.ne.s32.totalorder %s2483_s6, %s2003_s15  ;;  %p2007_p0 = scmp.lt.u32.totalorder %s2003_s15, %s2483_s6 }
 0x553   :  { %p2009_p1 = pnand %p2007_p0, %p2004_p13 }
 0x555   :  { %2012 = shalt.err (!%p2009_p1)
}
 0x556   :  { %s2024_s20 = smov 32   ;;  %s2025_s21 = smov 2  }
 0x557   :  { %1534 = dma.vmem_to_hbm [thread:$0]  %s1529_s13, 64, %s2483_s6, [#allocation5], %s2024_s20, %s2024_s20, %s2025_s21  }
 0x558   :  { %2015 = dma.done.wait [#allocation5], 64  }
 0x559   :  { %2016 = vsyncadd [#allocation5], 4294967232 }
 0x55a   :  { %1538 = vsyncpa [#allocation4], 1 }
 0x55b   :  { %1539 = vsyncpa [#allocation5], 1 }

</bundles_post_ra>
